<compile_context>
chip_gen: v6e
topology: v6e:2x2x1
jax: 0.10.0
libtpu: 0.0.40
codegen_flags: <defaults>
</compile_context>

<pallas_src>
import functools

import jax
import jax.numpy as jnp
from jax.experimental import pallas as pl
from jax.experimental.pallas import tpu as pltpu

SH_C0 = 0.28209479177387814
SH_C1 = 0.4886025119029199

PREP_BLOCK = 1024    # gaussians per preprocess grid step (8 sublanes x 128 lanes)
SPLAT_CHUNK = 512    # gaussians per SMEM-streamed chunk in the splat kernel
NUM_ATTR = 16        # packed attribute rows per gaussian


# --------------------------------------------------------------------------
# Kernel 1: per-gaussian preprocessing (full (8,128)-vreg channel layout)
# --------------------------------------------------------------------------
def preprocess_kernel(par_ref, pws_ref, low_ref, high_ref,
                      araw_ref, sraw_ref, rraw_ref, out_ref):
    # --- scalar camera parameters from SMEM ---
    R = [[par_ref[3 * r + c] for c in range(3)] for r in range(3)]
    tcw = [par_ref[9 + i] for i in range(3)]
    twc = [par_ref[12 + i] for i in range(3)]
    fx, fy = par_ref[15], par_ref[16]
    cx, cy = par_ref[17], par_ref[18]
    width, height = par_ref[19], par_ref[20]
    n_real = par_ref[21]

    # each channel slice is a full (8, 128) vreg
    pwx, pwy, pwz = pws_ref[0], pws_ref[1], pws_ref[2]

    # --- activations: get_alphas / get_scales / get_rots ---
    alphas = jax.nn.sigmoid(araw_ref[0])
    sx, sy, sz = jnp.exp(sraw_ref[0]), jnp.exp(sraw_ref[1]), jnp.exp(sraw_ref[2])
    qw, qx, qy, qz = rraw_ref[0], rraw_ref[1], rraw_ref[2], rraw_ref[3]
    qn = jax.lax.rsqrt(qw * qw + qx * qx + qy * qy + qz * qz + 1e-12)
    qw, qx, qy, qz = qw * qn, qx * qn, qy * qn, qz * qn

    # --- gsc.project ---
    pcx = R[0][0] * pwx + R[0][1] * pwy + R[0][2] * pwz + tcw[0]
    pcy = R[1][0] * pwx + R[1][1] * pwy + R[1][2] * pwz + tcw[1]
    pcz = R[2][0] * pwx + R[2][1] * pwy + R[2][2] * pwz + tcw[2]
    depth = pcz
    zinv = pl.reciprocal(pcz, approx=True)          # EUP, off the VALU path
    ux = fx * pcx * zinv + cx
    uy = fy * pcy * zinv + cy

    # --- gsc.computeCov3D:  Sigma = (R(q) S)(R(q) S)^T ---
    r00 = 1.0 - 2.0 * (qy * qy + qz * qz)
    r01 = 2.0 * (qx * qy - qw * qz)
    r02 = 2.0 * (qx * qz + qw * qy)
    r10 = 2.0 * (qx * qy + qw * qz)
    r11 = 1.0 - 2.0 * (qx * qx + qz * qz)
    r12 = 2.0 * (qy * qz - qw * qx)
    r20 = 2.0 * (qx * qz - qw * qy)
    r21 = 2.0 * (qy * qz + qw * qx)
    r22 = 1.0 - 2.0 * (qx * qx + qy * qy)
    m00, m01, m02 = r00 * sx, r01 * sy, r02 * sz
    m10, m11, m12 = r10 * sx, r11 * sy, r12 * sz
    m20, m21, m22 = r20 * sx, r21 * sy, r22 * sz
    c00 = m00 * m00 + m01 * m01 + m02 * m02
    c01 = m00 * m10 + m01 * m11 + m02 * m12
    c02 = m00 * m20 + m01 * m21 + m02 * m22
    c11 = m10 * m10 + m11 * m11 + m12 * m12
    c12 = m10 * m20 + m11 * m21 + m12 * m22
    c22 = m20 * m20 + m21 * m21 + m22 * m22

    # --- gsc.computeCov2D:  cov2d = T Sigma T^T,  T = J Rcw ---
    tanfovx = width / (2.0 * fx)
    tanfovy = height / (2.0 * fy)
    limx = 1.3 * tanfovx
    limy = 1.3 * tanfovy
    tx = jnp.clip(pcx * zinv, -limx, limx) * pcz
    ty = jnp.clip(pcy * zinv, -limy, limy) * pcz
    j00 = fx * zinv
    j02 = -fx * tx * zinv * zinv
    j11 = fy * zinv
    j12 = -fy * ty * zinv * zinv
    t00 = j00 * R[0][0] + j02 * R[2][0]
    t01 = j00 * R[0][1] + j02 * R[2][1]
    t02 = j00 * R[0][2] + j02 * R[2][2]
    t10 = j11 * R[1][0] + j12 * R[2][0]
    t11 = j11 * R[1][1] + j12 * R[2][1]
    t12 = j11 * R[1][2] + j12 * R[2][2]
    v00 = c00 * t00 + c01 * t01 + c02 * t02
    v01 = c01 * t00 + c11 * t01 + c12 * t02
    v02 = c02 * t00 + c12 * t01 + c22 * t02
    v10 = c00 * t10 + c01 * t11 + c02 * t12
    v11 = c01 * t10 + c11 * t11 + c12 * t12
    v12 = c02 * t10 + c12 * t11 + c22 * t12
    cov_a = t00 * v00 + t01 * v01 + t02 * v02 + 0.3
    cov_b = t10 * v00 + t11 * v01 + t12 * v02
    cov_c = t10 * v10 + t11 * v11 + t12 * v12 + 0.3

    # --- gsc.inverseCov2D ---
    det = cov_a * cov_c - cov_b * cov_b
    det_inv = pl.reciprocal(det, approx=True)       # EUP
    cinv_a = cov_c * det_inv
    cinv_b = -cov_b * det_inv
    cinv_c = cov_a * det_inv
    mid = 0.5 * (cov_a + cov_c)
    lam = mid + jnp.sqrt(jnp.maximum(mid * mid - det, 0.1))
    radius = jnp.ceil(3.0 * jnp.sqrt(lam))

    # --- gsc.sh2Color (degree-1 spherical harmonics) ---
    dxv = pwx - twc[0]
    dyv = pwy - twc[1]
    dzv = pwz - twc[2]
    dn = jax.lax.rsqrt(dxv * dxv + dyv * dyv + dzv * dzv + 1e-12)
    dxv, dyv, dzv = dxv * dn, dyv * dn, dzv * dn
    col_r = SH_C0 * low_ref[0] + SH_C1 * (-dyv * high_ref[0]
                                          + dzv * high_ref[3]
                                          - dxv * high_ref[6]) + 0.5
    col_g = SH_C0 * low_ref[1] + SH_C1 * (-dyv * high_ref[1]
                                          + dzv * high_ref[4]
                                          - dxv * high_ref[7]) + 0.5
    col_b = SH_C0 * low_ref[2] + SH_C1 * (-dyv * high_ref[2]
                                          + dzv * high_ref[5]
                                          - dxv * high_ref[8]) + 0.5
    col_r = jnp.maximum(col_r, 0.0)
    col_g = jnp.maximum(col_g, 0.0)
    col_b = jnp.maximum(col_b, 0.0)

    # --- fused validity masking (padding index, near clip, degenerate cov) ---
    gidx = (pl.program_id(0) * PREP_BLOCK
            + jax.lax.broadcasted_iota(jnp.int32, (8, 128), 0) * 128
            + jax.lax.broadcasted_iota(jnp.int32, (8, 128), 1)).astype(jnp.float32)
    valid = jnp.logical_and(gidx < n_real,
                            jnp.logical_and(depth > 0.2, det > 0.0))

    zeros = jnp.zeros_like(ux)
    out_ref[0] = ux
    out_ref[1] = uy
    out_ref[2] = depth
    out_ref[3] = cinv_a
    out_ref[4] = cinv_b
    out_ref[5] = cinv_c
    out_ref[6] = col_r
    out_ref[7] = col_g
    out_ref[8] = col_b
    out_ref[9] = jnp.where(valid, alphas, 0.0)      # masked alpha
    out_ref[10] = jnp.where(valid, radius, -1e6)    # masked radius -> always culled
    out_ref[11] = jnp.where(valid, depth, 1e30)     # depth sort key
    out_ref[12] = zeros
    out_ref[13] = zeros
    out_ref[14] = zeros
    out_ref[15] = zeros


def preprocess(params_vec, pws_t, low_t, high_t, araw_t, sraw_t, rraw_t):
    nrows = pws_t.shape[1]                    # np_pad // 128
    nsteps = nrows // 8                       # 1024 gaussians per step

    def tiled(c):
        return pl.BlockSpec((c, 8, 128), lambda i: (0, i, 0))

    return pl.pallas_call(
        preprocess_kernel,
        out_shape=jax.ShapeDtypeStruct((NUM_ATTR, nrows, 128), jnp.float32),
        grid=(nsteps,),
        in_specs=[pl.BlockSpec(memory_space=pltpu.MemorySpace.SMEM),
                  tiled(3), tiled(3), tiled(9), tiled(1), tiled(3), tiled(4)],
        out_specs=tiled(NUM_ATTR),
        compiler_params=pltpu.CompilerParams(
            dimension_semantics=("parallel",)),
    )(params_vec, pws_t, low_t, high_t, araw_t, sraw_t, rraw_t)


# --------------------------------------------------------------------------
# Kernel 2: splat — per pixel-tile front-to-back alpha compositing with
# double-buffered HBM->SMEM attribute streaming + radius culling + early exit
# --------------------------------------------------------------------------
def splat_kernel(attrs_ref, img_ref, buf_ref, sem_ref, tau_ref, done_ref,
                 *, th, tw, gb, nchunks):
    i = pl.program_id(0)
    j = pl.program_id(1)
    y0 = (i * th).astype(jnp.float32)
    x0 = (j * tw).astype(jnp.float32)
    py = jax.lax.broadcasted_iota(jnp.float32, (th, tw), 0) + y0
    px = jax.lax.broadcasted_iota(jnp.float32, (th, tw), 1) + x0
    yc = y0 + 0.5 * th                 # tile center (conservative overlap test)
    xc = x0 + 0.5 * tw
    half_h = 0.5 * th
    half_w = 0.5 * tw

    img_ref[...] = jnp.zeros((3, th, tw), jnp.float32)
    tau_ref[...] = jnp.ones((th, tw), jnp.float32)
    done_ref[0] = jnp.int32(0)

    def fetch(c, slot):
        start = pl.multiple_of(c * gb, gb)
        pltpu.make_async_copy(attrs_ref.at[:, pl.ds(start, gb)],
                              buf_ref.at[slot], sem_ref.at[slot]).start()

    fetch(0, 0)

    @pl.loop(0, nchunks)
    def _chunk(c):
        slot = c & 1
        # wait for the chunk fetched for this iteration
        pltpu.make_async_copy(
            attrs_ref.at[:, pl.ds(pl.multiple_of(c * gb, gb), gb)],
            buf_ref.at[slot], sem_ref.at[slot]).wait()

        # prefetch the next chunk (always issued so every DMA is waited on)
        @pl.when(c + 1 < nchunks)
        def _():
            fetch(c + 1, 1 - slot)

        # whole-tile early exit: skip compute once the tile is saturated
        @pl.when(done_ref[0] == 0)
        def _compute():
            cur = buf_ref.at[slot]

            def body(g, carry):
                ux = cur[0, g]
                uy = cur[1, g]
                rad = cur[10, g]
                # radius/tile overlap cull (scalar unit, ~free)
                hit = jnp.logical_and(jnp.abs(uy - yc) <= rad + half_h,
                                      jnp.abs(ux - xc) <= rad + half_w)

                @pl.when(hit)
                def _():
                    ca = cur[3, g]
                    cb = cur[4, g]
                    cc = cur[5, g]
                    cr = cur[6, g]
                    cg = cur[7, g]
                    cbl = cur[8, g]
                    al = cur[9, g]
                    # scalar precompute of the quadratic-form coefficients
                    na = -0.5 * ca
                    nc = -0.5 * cc
                    nb = -cb
                    dx = px - ux
                    dy = py - uy
                    power = (na * dx) * dx + (nc * dy) * dy + nb * (dx * dy)
                    alpha_i = jnp.minimum(0.99, al * jnp.exp(power))
                    ok = jnp.logical_and(power <= 0.0, alpha_i >= (1.0 / 255.0))
                    tau = tau_ref[...]
                    test_tau = tau * (1.0 - alpha_i)
                    done_now = test_tau < 1e-4
                    contrib = jnp.where(
                        jnp.logical_and(ok, jnp.logical_not(done_now)),
                        tau * alpha_i, 0.0)
                    img_ref[0, :, :] = img_ref[0, :, :] + contrib * cr
                    img_ref[1, :, :] = img_ref[1, :, :] + contrib * cg
                    img_ref[2, :, :] = img_ref[2, :, :] + contrib * cbl
                    # per-pixel termination (tau -> 0) matches the reference
                    # image; final transmittance itself is not an output here.
                    tau_ref[...] = jnp.where(
                        ok, jnp.where(done_now, 0.0, test_tau), tau)

                return carry

            jax.lax.fori_loop(0, gb, body, 0, unroll=4)

            max_tau = jnp.max(tau_ref[...])
            done_ref[0] = (max_tau < 1e-4).astype(jnp.int32)

    # TODO(synk): composite a background color with the remaining
    #             transmittance if the reference gsc.splat does (bg = 0 here).


def splat(attrs_sorted, height, width, *, tile_h=16, tile_w=128, gb=SPLAT_CHUNK):
    ng = attrs_sorted.shape[1]
    assert ng % gb == 0, "gaussian count must be padded to a chunk multiple"
    assert height % tile_h == 0 and width % tile_w == 0
    nchunks = ng // gb
    kern = functools.partial(splat_kernel, th=tile_h, tw=tile_w, gb=gb,
                             nchunks=nchunks)
    return pl.pallas_call(
        kern,
        out_shape=jax.ShapeDtypeStruct((3, height, width), jnp.float32),
        grid=(height // tile_h, width // tile_w),
        in_specs=[pl.BlockSpec(memory_space=pl.ANY)],     # attrs stay in HBM
        out_specs=pl.BlockSpec((3, tile_h, tile_w), lambda i, j: (0, i, j)),
        scratch_shapes=[
            pltpu.SMEM((2, NUM_ATTR, gb), jnp.float32),   # double-buffered chunk
            pltpu.SemaphoreType.DMA((2,)),
            pltpu.VMEM((tile_h, tile_w), jnp.float32),    # transmittance tau
            pltpu.SMEM((1,), jnp.int32),                  # tile-done flag
        ],
        compiler_params=pltpu.CompilerParams(
            dimension_semantics=("parallel", "parallel")),
    )(attrs_sorted)


# --------------------------------------------------------------------------
# GSModel.forward equivalent
# --------------------------------------------------------------------------
def gs_forward(pws, low_shs, high_shs, alphas_raw, scales_raw, rots_raw, cam):
    n = pws.shape[0]
    np_pad = ((n + PREP_BLOCK - 1) // PREP_BLOCK) * PREP_BLOCK

    def pad_t(x, fill_row):
        x = x.astype(jnp.float32)
        pad = jnp.broadcast_to(
            jnp.asarray(fill_row, jnp.float32)[None, :],
            (np_pad - n, x.shape[1]))
        xp = jnp.concatenate([x, pad], axis=0)          # (np_pad, C)
        return xp.T.reshape(x.shape[1], np_pad // 128, 128)

    pws_t = pad_t(pws, [0.0, 0.0, 1.0])
    low_t = pad_t(low_shs, [0.0] * 3)
    high_t = pad_t(high_shs, [0.0] * 9)
    araw_t = pad_t(alphas_raw, [-10.0])
    sraw_t = pad_t(scales_raw, [-5.0] * 3)
    rraw_t = pad_t(rots_raw, [1.0, 0.0, 0.0, 0.0])

    Rcw = jnp.asarray(cam["Rcw"], jnp.float32)
    tcw = jnp.asarray(cam["tcw"], jnp.float32)
    twc = -Rcw.T @ tcw
    params = jnp.concatenate([
        Rcw.reshape(-1), tcw, twc,
        jnp.array([cam["fx"], cam["fy"], cam["cx"], cam["cy"],
                   cam["width"], cam["height"], float(n), 0.0], jnp.float32)])

    attrs = preprocess(params, pws_t, low_t, high_t, araw_t, sraw_t, rraw_t)
    attrs = attrs.reshape(NUM_ATTR, np_pad)

    # glue: global front-to-back depth sort (invalid gaussians carry key 1e30
    # and zero alpha / negative radius, so they never contribute)
    order = jnp.argsort(attrs[11])
    attrs_sorted = attrs[:, order]

    image = splat(attrs_sorted, int(cam["height"]), int(cam["width"]))
    mask = attrs[2, :n] > 0.2            # == (depths > 0.2), stored as self.mask
    return image, mask


# --------------------------------------------------------------------------
if __name__ == "__main__":
    key = jax.random.PRNGKey(0)
    k = jax.random.split(key, 8)

    N = 100
    H, W = 32, 128
    cam = dict(
        Rcw=jnp.eye(3, dtype=jnp.float32),
        tcw=jnp.zeros((3,), jnp.float32),
        fx=100.0, fy=100.0, cx=W / 2.0, cy=H / 2.0,
        width=float(W), height=float(H),
    )

    z = jax.random.uniform(k[0], (N, 1), minval=2.0, maxval=5.0)
    x = jax.random.normal(k[1], (N, 1)) * 0.6
    y = jax.random.normal(k[2], (N, 1)) * 0.15
    pws = jnp.concatenate([x, y, z], axis=1)                 # (N, 3)
    low_shs = 0.5 + 0.3 * jax.random.normal(k[3], (N, 3))    # sh degree 0
    high_shs = 0.1 * jax.random.normal(k[4], (N, 9))         # sh degree 1
    alphas_raw = jax.random.normal(k[5], (N, 1))
    scales_raw = -3.0 + 0.3 * jax.random.normal(k[6], (N, 3))
    rots_raw = jax.random.normal(k[7], (N, 4))

    image, mask = gs_forward(pws, low_shs, high_shs,
                             alphas_raw, scales_raw, rots_raw, cam)
    jax.block_until_ready(image)
    jax.block_until_ready(mask)
    assert image.shape == (3, H, W) and image.dtype == jnp.float32
    assert mask.shape == (N,)
    print("KERNEL_OK")
</pallas_src>

<mosaic_0001>
module attributes {stable_mosaic.version = 11 : i64} {
  func.func @preprocess_kernel(%arg0: i32, %arg1: memref<23xf32, #tpu.memory_space<smem>>, %arg2: memref<3x8x128xf32, #tpu.memory_space<vmem>>, %arg3: memref<3x8x128xf32, #tpu.memory_space<vmem>>, %arg4: memref<9x8x128xf32, #tpu.memory_space<vmem>>, %arg5: memref<1x8x128xf32, #tpu.memory_space<vmem>>, %arg6: memref<3x8x128xf32, #tpu.memory_space<vmem>>, %arg7: memref<4x8x128xf32, #tpu.memory_space<vmem>>, %arg8: memref<16x8x128xf32, #tpu.memory_space<vmem>>) attributes {dimension_semantics = [#tpu.dimension_semantics<parallel>], iteration_bounds = array<i64: 1>, scalar_prefetch = 0 : i64, scratch_operands = 0 : i64, tpu.core_type = #tpu.core_type<tc>, window_params = [{transform_indices = @transform_0, window_bounds = array<i64: 23>}, {transform_indices = @transform_1, window_bounds = array<i64: 3, 8, 128>}, {transform_indices = @transform_2, window_bounds = array<i64: 3, 8, 128>}, {transform_indices = @transform_3, window_bounds = array<i64: 9, 8, 128>}, {transform_indices = @transform_4, window_bounds = array<i64: 1, 8, 128>}, {transform_indices = @transform_5, window_bounds = array<i64: 3, 8, 128>}, {transform_indices = @transform_6, window_bounds = array<i64: 4, 8, 128>}, {transform_indices = @transform_7, window_bounds = array<i64: 16, 8, 128>}]} {
    %c0 = arith.constant 0 : index
    %0 = memref.load %arg1[%c0] : memref<23xf32, #tpu.memory_space<smem>>
    %c1 = arith.constant 1 : index
    %1 = memref.load %arg1[%c1] : memref<23xf32, #tpu.memory_space<smem>>
    %c2 = arith.constant 2 : index
    %2 = memref.load %arg1[%c2] : memref<23xf32, #tpu.memory_space<smem>>
    %c3 = arith.constant 3 : index
    %3 = memref.load %arg1[%c3] : memref<23xf32, #tpu.memory_space<smem>>
    %c4 = arith.constant 4 : index
    %4 = memref.load %arg1[%c4] : memref<23xf32, #tpu.memory_space<smem>>
    %c5 = arith.constant 5 : index
    %5 = memref.load %arg1[%c5] : memref<23xf32, #tpu.memory_space<smem>>
    %c6 = arith.constant 6 : index
    %6 = memref.load %arg1[%c6] : memref<23xf32, #tpu.memory_space<smem>>
    %c7 = arith.constant 7 : index
    %7 = memref.load %arg1[%c7] : memref<23xf32, #tpu.memory_space<smem>>
    %c8 = arith.constant 8 : index
    %8 = memref.load %arg1[%c8] : memref<23xf32, #tpu.memory_space<smem>>
    %c9 = arith.constant 9 : index
    %9 = memref.load %arg1[%c9] : memref<23xf32, #tpu.memory_space<smem>>
    %c10 = arith.constant 10 : index
    %10 = memref.load %arg1[%c10] : memref<23xf32, #tpu.memory_space<smem>>
    %c11 = arith.constant 11 : index
    %11 = memref.load %arg1[%c11] : memref<23xf32, #tpu.memory_space<smem>>
    %c12 = arith.constant 12 : index
    %12 = memref.load %arg1[%c12] : memref<23xf32, #tpu.memory_space<smem>>
    %c13 = arith.constant 13 : index
    %13 = memref.load %arg1[%c13] : memref<23xf32, #tpu.memory_space<smem>>
    %c14 = arith.constant 14 : index
    %14 = memref.load %arg1[%c14] : memref<23xf32, #tpu.memory_space<smem>>
    %c15 = arith.constant 15 : index
    %15 = memref.load %arg1[%c15] : memref<23xf32, #tpu.memory_space<smem>>
    %c16 = arith.constant 16 : index
    %16 = memref.load %arg1[%c16] : memref<23xf32, #tpu.memory_space<smem>>
    %c17 = arith.constant 17 : index
    %17 = memref.load %arg1[%c17] : memref<23xf32, #tpu.memory_space<smem>>
    %c18 = arith.constant 18 : index
    %18 = memref.load %arg1[%c18] : memref<23xf32, #tpu.memory_space<smem>>
    %c19 = arith.constant 19 : index
    %19 = memref.load %arg1[%c19] : memref<23xf32, #tpu.memory_space<smem>>
    %c20 = arith.constant 20 : index
    %20 = memref.load %arg1[%c20] : memref<23xf32, #tpu.memory_space<smem>>
    %c21 = arith.constant 21 : index
    %21 = memref.load %arg1[%c21] : memref<23xf32, #tpu.memory_space<smem>>
    %c0_0 = arith.constant 0 : index
    %c0_1 = arith.constant 0 : index
    %c0_2 = arith.constant 0 : index
    %22 = vector.load %arg2[%c0_0, %c0_1, %c0_2] : memref<3x8x128xf32, #tpu.memory_space<vmem>>, vector<1x8x128xf32>
    %23 = vector.shape_cast %22 : vector<1x8x128xf32> to vector<8x128xf32>
    %c1_3 = arith.constant 1 : index
    %c0_4 = arith.constant 0 : index
    %c0_5 = arith.constant 0 : index
    %24 = vector.load %arg2[%c1_3, %c0_4, %c0_5] : memref<3x8x128xf32, #tpu.memory_space<vmem>>, vector<1x8x128xf32>
    %25 = vector.shape_cast %24 : vector<1x8x128xf32> to vector<8x128xf32>
    %c2_6 = arith.constant 2 : index
    %c0_7 = arith.constant 0 : index
    %c0_8 = arith.constant 0 : index
    %26 = vector.load %arg2[%c2_6, %c0_7, %c0_8] : memref<3x8x128xf32, #tpu.memory_space<vmem>>, vector<1x8x128xf32>
    %27 = vector.shape_cast %26 : vector<1x8x128xf32> to vector<8x128xf32>
    %c0_9 = arith.constant 0 : index
    %c0_10 = arith.constant 0 : index
    %c0_11 = arith.constant 0 : index
    %28 = vector.load %arg5[%c0_9, %c0_10, %c0_11] : memref<1x8x128xf32, #tpu.memory_space<vmem>>, vector<1x8x128xf32>
    %29 = vector.shape_cast %28 : vector<1x8x128xf32> to vector<8x128xf32>
    %30 = arith.negf %29 : vector<8x128xf32>
    %31 = math.exp %30 : vector<8x128xf32>
    %cst = arith.constant 1.000000e+00 : f32
    %32 = vector.broadcast %cst : f32 to vector<8x128xf32>
    %33 = arith.addf %32, %31 : vector<8x128xf32>
    %34 = arith.divf %32, %33 : vector<8x128xf32>
    %c0_12 = arith.constant 0 : index
    %c0_13 = arith.constant 0 : index
    %c0_14 = arith.constant 0 : index
    %35 = vector.load %arg6[%c0_12, %c0_13, %c0_14] : memref<3x8x128xf32, #tpu.memory_space<vmem>>, vector<1x8x128xf32>
    %36 = vector.shape_cast %35 : vector<1x8x128xf32> to vector<8x128xf32>
    %37 = math.exp %36 : vector<8x128xf32>
    %c1_15 = arith.constant 1 : index
    %c0_16 = arith.constant 0 : index
    %c0_17 = arith.constant 0 : index
    %38 = vector.load %arg6[%c1_15, %c0_16, %c0_17] : memref<3x8x128xf32, #tpu.memory_space<vmem>>, vector<1x8x128xf32>
    %39 = vector.shape_cast %38 : vector<1x8x128xf32> to vector<8x128xf32>
    %40 = math.exp %39 : vector<8x128xf32>
    %c2_18 = arith.constant 2 : index
    %c0_19 = arith.constant 0 : index
    %c0_20 = arith.constant 0 : index
    %41 = vector.load %arg6[%c2_18, %c0_19, %c0_20] : memref<3x8x128xf32, #tpu.memory_space<vmem>>, vector<1x8x128xf32>
    %42 = vector.shape_cast %41 : vector<1x8x128xf32> to vector<8x128xf32>
    %43 = math.exp %42 : vector<8x128xf32>
    %c0_21 = arith.constant 0 : index
    %c0_22 = arith.constant 0 : index
    %c0_23 = arith.constant 0 : index
    %44 = vector.load %arg7[%c0_21, %c0_22, %c0_23] : memref<4x8x128xf32, #tpu.memory_space<vmem>>, vector<1x8x128xf32>
    %45 = vector.shape_cast %44 : vector<1x8x128xf32> to vector<8x128xf32>
    %c1_24 = arith.constant 1 : index
    %c0_25 = arith.constant 0 : index
    %c0_26 = arith.constant 0 : index
    %46 = vector.load %arg7[%c1_24, %c0_25, %c0_26] : memref<4x8x128xf32, #tpu.memory_space<vmem>>, vector<1x8x128xf32>
    %47 = vector.shape_cast %46 : vector<1x8x128xf32> to vector<8x128xf32>
    %c2_27 = arith.constant 2 : index
    %c0_28 = arith.constant 0 : index
    %c0_29 = arith.constant 0 : index
    %48 = vector.load %arg7[%c2_27, %c0_28, %c0_29] : memref<4x8x128xf32, #tpu.memory_space<vmem>>, vector<1x8x128xf32>
    %49 = vector.shape_cast %48 : vector<1x8x128xf32> to vector<8x128xf32>
    %c3_30 = arith.constant 3 : index
    %c0_31 = arith.constant 0 : index
    %c0_32 = arith.constant 0 : index
    %50 = vector.load %arg7[%c3_30, %c0_31, %c0_32] : memref<4x8x128xf32, #tpu.memory_space<vmem>>, vector<1x8x128xf32>
    %51 = vector.shape_cast %50 : vector<1x8x128xf32> to vector<8x128xf32>
    %52 = arith.mulf %45, %45 : vector<8x128xf32>
    %53 = arith.mulf %47, %47 : vector<8x128xf32>
    %54 = arith.addf %52, %53 : vector<8x128xf32>
    %55 = arith.mulf %49, %49 : vector<8x128xf32>
    %56 = arith.addf %54, %55 : vector<8x128xf32>
    %57 = arith.mulf %51, %51 : vector<8x128xf32>
    %58 = arith.addf %56, %57 : vector<8x128xf32>
    %cst_33 = arith.constant 9.99999996E-13 : f32
    %59 = vector.broadcast %cst_33 : f32 to vector<8x128xf32>
    %60 = arith.addf %58, %59 : vector<8x128xf32>
    %61 = math.rsqrt %60 : vector<8x128xf32>
    %62 = arith.mulf %45, %61 : vector<8x128xf32>
    %63 = arith.mulf %47, %61 : vector<8x128xf32>
    %64 = arith.mulf %49, %61 : vector<8x128xf32>
    %65 = arith.mulf %51, %61 : vector<8x128xf32>
    %66 = vector.broadcast %0 : f32 to vector<8x128xf32>
    %67 = arith.mulf %66, %23 : vector<8x128xf32>
    %68 = vector.broadcast %1 : f32 to vector<8x128xf32>
    %69 = arith.mulf %68, %25 : vector<8x128xf32>
    %70 = arith.addf %67, %69 : vector<8x128xf32>
    %71 = vector.broadcast %2 : f32 to vector<8x128xf32>
    %72 = arith.mulf %71, %27 : vector<8x128xf32>
    %73 = arith.addf %70, %72 : vector<8x128xf32>
    %74 = vector.broadcast %9 : f32 to vector<8x128xf32>
    %75 = arith.addf %73, %74 : vector<8x128xf32>
    %76 = vector.broadcast %3 : f32 to vector<8x128xf32>
    %77 = arith.mulf %76, %23 : vector<8x128xf32>
    %78 = vector.broadcast %4 : f32 to vector<8x128xf32>
    %79 = arith.mulf %78, %25 : vector<8x128xf32>
    %80 = arith.addf %77, %79 : vector<8x128xf32>
    %81 = vector.broadcast %5 : f32 to vector<8x128xf32>
    %82 = arith.mulf %81, %27 : vector<8x128xf32>
    %83 = arith.addf %80, %82 : vector<8x128xf32>
    %84 = vector.broadcast %10 : f32 to vector<8x128xf32>
    %85 = arith.addf %83, %84 : vector<8x128xf32>
    %86 = vector.broadcast %6 : f32 to vector<8x128xf32>
    %87 = arith.mulf %86, %23 : vector<8x128xf32>
    %88 = vector.broadcast %7 : f32 to vector<8x128xf32>
    %89 = arith.mulf %88, %25 : vector<8x128xf32>
    %90 = arith.addf %87, %89 : vector<8x128xf32>
    %91 = vector.broadcast %8 : f32 to vector<8x128xf32>
    %92 = arith.mulf %91, %27 : vector<8x128xf32>
    %93 = arith.addf %90, %92 : vector<8x128xf32>
    %94 = vector.broadcast %11 : f32 to vector<8x128xf32>
    %95 = arith.addf %93, %94 : vector<8x128xf32>
    %96 = tpu.reciprocal %95 {approx = true} : vector<8x128xf32> -> vector<8x128xf32>
    %97 = vector.broadcast %15 : f32 to vector<8x128xf32>
    %98 = arith.mulf %97, %75 : vector<8x128xf32>
    %99 = arith.mulf %98, %96 : vector<8x128xf32>
    %100 = vector.broadcast %17 : f32 to vector<8x128xf32>
    %101 = arith.addf %99, %100 : vector<8x128xf32>
    %102 = vector.broadcast %16 : f32 to vector<8x128xf32>
    %103 = arith.mulf %102, %85 : vector<8x128xf32>
    %104 = arith.mulf %103, %96 : vector<8x128xf32>
    %105 = vector.broadcast %18 : f32 to vector<8x128xf32>
    %106 = arith.addf %104, %105 : vector<8x128xf32>
    %107 = arith.mulf %64, %64 : vector<8x128xf32>
    %108 = arith.mulf %65, %65 : vector<8x128xf32>
    %109 = arith.addf %107, %108 : vector<8x128xf32>
    %cst_34 = arith.constant 2.000000e+00 : f32
    %110 = vector.broadcast %cst_34 : f32 to vector<8x128xf32>
    %111 = arith.mulf %110, %109 : vector<8x128xf32>
    %cst_35 = arith.constant 1.000000e+00 : f32
    %112 = vector.broadcast %cst_35 : f32 to vector<8x128xf32>
    %113 = arith.subf %112, %111 : vector<8x128xf32>
    %114 = arith.mulf %63, %64 : vector<8x128xf32>
    %115 = arith.mulf %62, %65 : vector<8x128xf32>
    %116 = arith.subf %114, %115 : vector<8x128xf32>
    %cst_36 = arith.constant 2.000000e+00 : f32
    %117 = vector.broadcast %cst_36 : f32 to vector<8x128xf32>
    %118 = arith.mulf %117, %116 : vector<8x128xf32>
    %119 = arith.mulf %63, %65 : vector<8x128xf32>
    %120 = arith.mulf %62, %64 : vector<8x128xf32>
    %121 = arith.addf %119, %120 : vector<8x128xf32>
    %cst_37 = arith.constant 2.000000e+00 : f32
    %122 = vector.broadcast %cst_37 : f32 to vector<8x128xf32>
    %123 = arith.mulf %122, %121 : vector<8x128xf32>
    %124 = arith.mulf %63, %64 : vector<8x128xf32>
    %125 = arith.mulf %62, %65 : vector<8x128xf32>
    %126 = arith.addf %124, %125 : vector<8x128xf32>
    %cst_38 = arith.constant 2.000000e+00 : f32
    %127 = vector.broadcast %cst_38 : f32 to vector<8x128xf32>
    %128 = arith.mulf %127, %126 : vector<8x128xf32>
    %129 = arith.mulf %63, %63 : vector<8x128xf32>
    %130 = arith.mulf %65, %65 : vector<8x128xf32>
    %131 = arith.addf %129, %130 : vector<8x128xf32>
    %cst_39 = arith.constant 2.000000e+00 : f32
    %132 = vector.broadcast %cst_39 : f32 to vector<8x128xf32>
    %133 = arith.mulf %132, %131 : vector<8x128xf32>
    %cst_40 = arith.constant 1.000000e+00 : f32
    %134 = vector.broadcast %cst_40 : f32 to vector<8x128xf32>
    %135 = arith.subf %134, %133 : vector<8x128xf32>
    %136 = arith.mulf %64, %65 : vector<8x128xf32>
    %137 = arith.mulf %62, %63 : vector<8x128xf32>
    %138 = arith.subf %136, %137 : vector<8x128xf32>
    %cst_41 = arith.constant 2.000000e+00 : f32
    %139 = vector.broadcast %cst_41 : f32 to vector<8x128xf32>
    %140 = arith.mulf %139, %138 : vector<8x128xf32>
    %141 = arith.mulf %63, %65 : vector<8x128xf32>
    %142 = arith.mulf %62, %64 : vector<8x128xf32>
    %143 = arith.subf %141, %142 : vector<8x128xf32>
    %cst_42 = arith.constant 2.000000e+00 : f32
    %144 = vector.broadcast %cst_42 : f32 to vector<8x128xf32>
    %145 = arith.mulf %144, %143 : vector<8x128xf32>
    %146 = arith.mulf %64, %65 : vector<8x128xf32>
    %147 = arith.mulf %62, %63 : vector<8x128xf32>
    %148 = arith.addf %146, %147 : vector<8x128xf32>
    %cst_43 = arith.constant 2.000000e+00 : f32
    %149 = vector.broadcast %cst_43 : f32 to vector<8x128xf32>
    %150 = arith.mulf %149, %148 : vector<8x128xf32>
    %151 = arith.mulf %63, %63 : vector<8x128xf32>
    %152 = arith.mulf %64, %64 : vector<8x128xf32>
    %153 = arith.addf %151, %152 : vector<8x128xf32>
    %cst_44 = arith.constant 2.000000e+00 : f32
    %154 = vector.broadcast %cst_44 : f32 to vector<8x128xf32>
    %155 = arith.mulf %154, %153 : vector<8x128xf32>
    %cst_45 = arith.constant 1.000000e+00 : f32
    %156 = vector.broadcast %cst_45 : f32 to vector<8x128xf32>
    %157 = arith.subf %156, %155 : vector<8x128xf32>
    %158 = arith.mulf %113, %37 : vector<8x128xf32>
    %159 = arith.mulf %118, %40 : vector<8x128xf32>
    %160 = arith.mulf %123, %43 : vector<8x128xf32>
    %161 = arith.mulf %128, %37 : vector<8x128xf32>
    %162 = arith.mulf %135, %40 : vector<8x128xf32>
    %163 = arith.mulf %140, %43 : vector<8x128xf32>
    %164 = arith.mulf %145, %37 : vector<8x128xf32>
    %165 = arith.mulf %150, %40 : vector<8x128xf32>
    %166 = arith.mulf %157, %43 : vector<8x128xf32>
    %167 = arith.mulf %158, %158 : vector<8x128xf32>
    %168 = arith.mulf %159, %159 : vector<8x128xf32>
    %169 = arith.addf %167, %168 : vector<8x128xf32>
    %170 = arith.mulf %160, %160 : vector<8x128xf32>
    %171 = arith.addf %169, %170 : vector<8x128xf32>
    %172 = arith.mulf %158, %161 : vector<8x128xf32>
    %173 = arith.mulf %159, %162 : vector<8x128xf32>
    %174 = arith.addf %172, %173 : vector<8x128xf32>
    %175 = arith.mulf %160, %163 : vector<8x128xf32>
    %176 = arith.addf %174, %175 : vector<8x128xf32>
    %177 = arith.mulf %158, %164 : vector<8x128xf32>
    %178 = arith.mulf %159, %165 : vector<8x128xf32>
    %179 = arith.addf %177, %178 : vector<8x128xf32>
    %180 = arith.mulf %160, %166 : vector<8x128xf32>
    %181 = arith.addf %179, %180 : vector<8x128xf32>
    %182 = arith.mulf %161, %161 : vector<8x128xf32>
    %183 = arith.mulf %162, %162 : vector<8x128xf32>
    %184 = arith.addf %182, %183 : vector<8x128xf32>
    %185 = arith.mulf %163, %163 : vector<8x128xf32>
    %186 = arith.addf %184, %185 : vector<8x128xf32>
    %187 = arith.mulf %161, %164 : vector<8x128xf32>
    %188 = arith.mulf %162, %165 : vector<8x128xf32>
    %189 = arith.addf %187, %188 : vector<8x128xf32>
    %190 = arith.mulf %163, %166 : vector<8x128xf32>
    %191 = arith.addf %189, %190 : vector<8x128xf32>
    %192 = arith.mulf %164, %164 : vector<8x128xf32>
    %193 = arith.mulf %165, %165 : vector<8x128xf32>
    %194 = arith.addf %192, %193 : vector<8x128xf32>
    %195 = arith.mulf %166, %166 : vector<8x128xf32>
    %196 = arith.addf %194, %195 : vector<8x128xf32>
    %cst_46 = arith.constant 2.000000e+00 : f32
    %197 = arith.mulf %cst_46, %15 : f32
    %198 = arith.divf %19, %197 : f32
    %cst_47 = arith.constant 2.000000e+00 : f32
    %199 = arith.mulf %cst_47, %16 : f32
    %200 = arith.divf %20, %199 : f32
    %cst_48 = arith.constant 1.300000e+00 : f32
    %201 = arith.mulf %cst_48, %198 : f32
    %cst_49 = arith.constant 1.300000e+00 : f32
    %202 = arith.mulf %cst_49, %200 : f32
    %203 = arith.mulf %75, %96 : vector<8x128xf32>
    %cst_50 = arith.constant 0.000000e+00 : f32
    %204 = arith.subf %cst_50, %201 : f32
    %205 = vector.broadcast %204 : f32 to vector<8x128xf32>
    %206 = arith.maximumf %205, %203 : vector<8x128xf32>
    %207 = vector.broadcast %201 : f32 to vector<8x128xf32>
    %208 = arith.minimumf %207, %206 : vector<8x128xf32>
    %209 = arith.mulf %208, %95 : vector<8x128xf32>
    %210 = arith.mulf %85, %96 : vector<8x128xf32>
    %cst_51 = arith.constant 0.000000e+00 : f32
    %211 = arith.subf %cst_51, %202 : f32
    %212 = vector.broadcast %211 : f32 to vector<8x128xf32>
    %213 = arith.maximumf %212, %210 : vector<8x128xf32>
    %214 = vector.broadcast %202 : f32 to vector<8x128xf32>
    %215 = arith.minimumf %214, %213 : vector<8x128xf32>
    %216 = arith.mulf %215, %95 : vector<8x128xf32>
    %217 = vector.broadcast %15 : f32 to vector<8x128xf32>
    %218 = arith.mulf %217, %96 : vector<8x128xf32>
    %cst_52 = arith.constant 0.000000e+00 : f32
    %219 = arith.subf %cst_52, %15 : f32
    %220 = vector.broadcast %219 : f32 to vector<8x128xf32>
    %221 = arith.mulf %220, %209 : vector<8x128xf32>
    %222 = arith.mulf %221, %96 : vector<8x128xf32>
    %223 = arith.mulf %222, %96 : vector<8x128xf32>
    %224 = vector.broadcast %16 : f32 to vector<8x128xf32>
    %225 = arith.mulf %224, %96 : vector<8x128xf32>
    %cst_53 = arith.constant 0.000000e+00 : f32
    %226 = arith.subf %cst_53, %16 : f32
    %227 = vector.broadcast %226 : f32 to vector<8x128xf32>
    %228 = arith.mulf %227, %216 : vector<8x128xf32>
    %229 = arith.mulf %228, %96 : vector<8x128xf32>
    %230 = arith.mulf %229, %96 : vector<8x128xf32>
    %231 = vector.broadcast %0 : f32 to vector<8x128xf32>
    %232 = arith.mulf %218, %231 : vector<8x128xf32>
    %233 = vector.broadcast %6 : f32 to vector<8x128xf32>
    %234 = arith.mulf %223, %233 : vector<8x128xf32>
    %235 = arith.addf %232, %234 : vector<8x128xf32>
    %236 = vector.broadcast %1 : f32 to vector<8x128xf32>
    %237 = arith.mulf %218, %236 : vector<8x128xf32>
    %238 = vector.broadcast %7 : f32 to vector<8x128xf32>
    %239 = arith.mulf %223, %238 : vector<8x128xf32>
    %240 = arith.addf %237, %239 : vector<8x128xf32>
    %241 = vector.broadcast %2 : f32 to vector<8x128xf32>
    %242 = arith.mulf %218, %241 : vector<8x128xf32>
    %243 = vector.broadcast %8 : f32 to vector<8x128xf32>
    %244 = arith.mulf %223, %243 : vector<8x128xf32>
    %245 = arith.addf %242, %244 : vector<8x128xf32>
    %246 = vector.broadcast %3 : f32 to vector<8x128xf32>
    %247 = arith.mulf %225, %246 : vector<8x128xf32>
    %248 = vector.broadcast %6 : f32 to vector<8x128xf32>
    %249 = arith.mulf %230, %248 : vector<8x128xf32>
    %250 = arith.addf %247, %249 : vector<8x128xf32>
    %251 = vector.broadcast %4 : f32 to vector<8x128xf32>
    %252 = arith.mulf %225, %251 : vector<8x128xf32>
    %253 = vector.broadcast %7 : f32 to vector<8x128xf32>
    %254 = arith.mulf %230, %253 : vector<8x128xf32>
    %255 = arith.addf %252, %254 : vector<8x128xf32>
    %256 = vector.broadcast %5 : f32 to vector<8x128xf32>
    %257 = arith.mulf %225, %256 : vector<8x128xf32>
    %258 = vector.broadcast %8 : f32 to vector<8x128xf32>
    %259 = arith.mulf %230, %258 : vector<8x128xf32>
    %260 = arith.addf %257, %259 : vector<8x128xf32>
    %261 = arith.mulf %171, %235 : vector<8x128xf32>
    %262 = arith.mulf %176, %240 : vector<8x128xf32>
    %263 = arith.addf %261, %262 : vector<8x128xf32>
    %264 = arith.mulf %181, %245 : vector<8x128xf32>
    %265 = arith.addf %263, %264 : vector<8x128xf32>
    %266 = arith.mulf %176, %235 : vector<8x128xf32>
    %267 = arith.mulf %186, %240 : vector<8x128xf32>
    %268 = arith.addf %266, %267 : vector<8x128xf32>
    %269 = arith.mulf %191, %245 : vector<8x128xf32>
    %270 = arith.addf %268, %269 : vector<8x128xf32>
    %271 = arith.mulf %181, %235 : vector<8x128xf32>
    %272 = arith.mulf %191, %240 : vector<8x128xf32>
    %273 = arith.addf %271, %272 : vector<8x128xf32>
    %274 = arith.mulf %196, %245 : vector<8x128xf32>
    %275 = arith.addf %273, %274 : vector<8x128xf32>
    %276 = arith.mulf %171, %250 : vector<8x128xf32>
    %277 = arith.mulf %176, %255 : vector<8x128xf32>
    %278 = arith.addf %276, %277 : vector<8x128xf32>
    %279 = arith.mulf %181, %260 : vector<8x128xf32>
    %280 = arith.addf %278, %279 : vector<8x128xf32>
    %281 = arith.mulf %176, %250 : vector<8x128xf32>
    %282 = arith.mulf %186, %255 : vector<8x128xf32>
    %283 = arith.addf %281, %282 : vector<8x128xf32>
    %284 = arith.mulf %191, %260 : vector<8x128xf32>
    %285 = arith.addf %283, %284 : vector<8x128xf32>
    %286 = arith.mulf %181, %250 : vector<8x128xf32>
    %287 = arith.mulf %191, %255 : vector<8x128xf32>
    %288 = arith.addf %286, %287 : vector<8x128xf32>
    %289 = arith.mulf %196, %260 : vector<8x128xf32>
    %290 = arith.addf %288, %289 : vector<8x128xf32>
    %291 = arith.mulf %235, %265 : vector<8x128xf32>
    %292 = arith.mulf %240, %270 : vector<8x128xf32>
    %293 = arith.addf %291, %292 : vector<8x128xf32>
    %294 = arith.mulf %245, %275 : vector<8x128xf32>
    %295 = arith.addf %293, %294 : vector<8x128xf32>
    %cst_54 = arith.constant 3.000000e-01 : f32
    %296 = vector.broadcast %cst_54 : f32 to vector<8x128xf32>
    %297 = arith.addf %295, %296 : vector<8x128xf32>
    %298 = arith.mulf %250, %265 : vector<8x128xf32>
    %299 = arith.mulf %255, %270 : vector<8x128xf32>
    %300 = arith.addf %298, %299 : vector<8x128xf32>
    %301 = arith.mulf %260, %275 : vector<8x128xf32>
    %302 = arith.addf %300, %301 : vector<8x128xf32>
    %303 = arith.mulf %250, %280 : vector<8x128xf32>
    %304 = arith.mulf %255, %285 : vector<8x128xf32>
    %305 = arith.addf %303, %304 : vector<8x128xf32>
    %306 = arith.mulf %260, %290 : vector<8x128xf32>
    %307 = arith.addf %305, %306 : vector<8x128xf32>
    %cst_55 = arith.constant 3.000000e-01 : f32
    %308 = vector.broadcast %cst_55 : f32 to vector<8x128xf32>
    %309 = arith.addf %307, %308 : vector<8x128xf32>
    %310 = arith.mulf %297, %309 : vector<8x128xf32>
    %311 = arith.mulf %302, %302 : vector<8x128xf32>
    %312 = arith.subf %310, %311 : vector<8x128xf32>
    %313 = tpu.reciprocal %312 {approx = true} : vector<8x128xf32> -> vector<8x128xf32>
    %314 = arith.mulf %309, %313 : vector<8x128xf32>
    %cst_56 = arith.constant 0.000000e+00 : f32
    %315 = vector.broadcast %cst_56 : f32 to vector<8x128xf32>
    %316 = arith.subf %315, %302 : vector<8x128xf32>
    %317 = arith.mulf %316, %313 : vector<8x128xf32>
    %318 = arith.mulf %297, %313 : vector<8x128xf32>
    %319 = arith.addf %297, %309 : vector<8x128xf32>
    %cst_57 = arith.constant 5.000000e-01 : f32
    %320 = vector.broadcast %cst_57 : f32 to vector<8x128xf32>
    %321 = arith.mulf %320, %319 : vector<8x128xf32>
    %322 = arith.mulf %321, %321 : vector<8x128xf32>
    %323 = arith.subf %322, %312 : vector<8x128xf32>
    %cst_58 = arith.constant 1.000000e-01 : f32
    %324 = vector.broadcast %cst_58 : f32 to vector<8x128xf32>
    %325 = arith.maximumf %323, %324 : vector<8x128xf32>
    %326 = math.sqrt %325 : vector<8x128xf32>
    %327 = arith.addf %321, %326 : vector<8x128xf32>
    %328 = math.sqrt %327 : vector<8x128xf32>
    %cst_59 = arith.constant 3.000000e+00 : f32
    %329 = vector.broadcast %cst_59 : f32 to vector<8x128xf32>
    %330 = arith.mulf %329, %328 : vector<8x128xf32>
    %331 = math.ceil %330 : vector<8x128xf32>
    %332 = vector.broadcast %12 : f32 to vector<8x128xf32>
    %333 = arith.subf %23, %332 : vector<8x128xf32>
    %334 = vector.broadcast %13 : f32 to vector<8x128xf32>
    %335 = arith.subf %25, %334 : vector<8x128xf32>
    %336 = vector.broadcast %14 : f32 to vector<8x128xf32>
    %337 = arith.subf %27, %336 : vector<8x128xf32>
    %338 = arith.mulf %333, %333 : vector<8x128xf32>
    %339 = arith.mulf %335, %335 : vector<8x128xf32>
    %340 = arith.addf %338, %339 : vector<8x128xf32>
    %341 = arith.mulf %337, %337 : vector<8x128xf32>
    %342 = arith.addf %340, %341 : vector<8x128xf32>
    %cst_60 = arith.constant 9.99999996E-13 : f32
    %343 = vector.broadcast %cst_60 : f32 to vector<8x128xf32>
    %344 = arith.addf %342, %343 : vector<8x128xf32>
    %345 = math.rsqrt %344 : vector<8x128xf32>
    %346 = arith.mulf %333, %345 : vector<8x128xf32>
    %347 = arith.mulf %335, %345 : vector<8x128xf32>
    %348 = arith.mulf %337, %345 : vector<8x128xf32>
    %c0_61 = arith.constant 0 : index
    %c0_62 = arith.constant 0 : index
    %c0_63 = arith.constant 0 : index
    %349 = vector.load %arg3[%c0_61, %c0_62, %c0_63] : memref<3x8x128xf32, #tpu.memory_space<vmem>>, vector<1x8x128xf32>
    %350 = vector.shape_cast %349 : vector<1x8x128xf32> to vector<8x128xf32>
    %cst_64 = arith.constant 0.282094806 : f32
    %351 = vector.broadcast %cst_64 : f32 to vector<8x128xf32>
    %352 = arith.mulf %351, %350 : vector<8x128xf32>
    %cst_65 = arith.constant 0.000000e+00 : f32
    %353 = vector.broadcast %cst_65 : f32 to vector<8x128xf32>
    %354 = arith.subf %353, %347 : vector<8x128xf32>
    %c0_66 = arith.constant 0 : index
    %c0_67 = arith.constant 0 : index
    %c0_68 = arith.constant 0 : index
    %355 = vector.load %arg4[%c0_66, %c0_67, %c0_68] : memref<9x8x128xf32, #tpu.memory_space<vmem>>, vector<1x8x128xf32>
    %356 = vector.shape_cast %355 : vector<1x8x128xf32> to vector<8x128xf32>
    %357 = arith.mulf %354, %356 : vector<8x128xf32>
    %c3_69 = arith.constant 3 : index
    %c0_70 = arith.constant 0 : index
    %c0_71 = arith.constant 0 : index
    %358 = vector.load %arg4[%c3_69, %c0_70, %c0_71] : memref<9x8x128xf32, #tpu.memory_space<vmem>>, vector<1x8x128xf32>
    %359 = vector.shape_cast %358 : vector<1x8x128xf32> to vector<8x128xf32>
    %360 = arith.mulf %348, %359 : vector<8x128xf32>
    %361 = arith.addf %357, %360 : vector<8x128xf32>
    %c6_72 = arith.constant 6 : index
    %c0_73 = arith.constant 0 : index
    %c0_74 = arith.constant 0 : index
    %362 = vector.load %arg4[%c6_72, %c0_73, %c0_74] : memref<9x8x128xf32, #tpu.memory_space<vmem>>, vector<1x8x128xf32>
    %363 = vector.shape_cast %362 : vector<1x8x128xf32> to vector<8x128xf32>
    %364 = arith.mulf %346, %363 : vector<8x128xf32>
    %365 = arith.subf %361, %364 : vector<8x128xf32>
    %cst_75 = arith.constant 0.488602519 : f32
    %366 = vector.broadcast %cst_75 : f32 to vector<8x128xf32>
    %367 = arith.mulf %366, %365 : vector<8x128xf32>
    %368 = arith.addf %352, %367 : vector<8x128xf32>
    %cst_76 = arith.constant 5.000000e-01 : f32
    %369 = vector.broadcast %cst_76 : f32 to vector<8x128xf32>
    %370 = arith.addf %368, %369 : vector<8x128xf32>
    %c1_77 = arith.constant 1 : index
    %c0_78 = arith.constant 0 : index
    %c0_79 = arith.constant 0 : index
    %371 = vector.load %arg3[%c1_77, %c0_78, %c0_79] : memref<3x8x128xf32, #tpu.memory_space<vmem>>, vector<1x8x128xf32>
    %372 = vector.shape_cast %371 : vector<1x8x128xf32> to vector<8x128xf32>
    %cst_80 = arith.constant 0.282094806 : f32
    %373 = vector.broadcast %cst_80 : f32 to vector<8x128xf32>
    %374 = arith.mulf %373, %372 : vector<8x128xf32>
    %cst_81 = arith.constant 0.000000e+00 : f32
    %375 = vector.broadcast %cst_81 : f32 to vector<8x128xf32>
    %376 = arith.subf %375, %347 : vector<8x128xf32>
    %c1_82 = arith.constant 1 : index
    %c0_83 = arith.constant 0 : index
    %c0_84 = arith.constant 0 : index
    %377 = vector.load %arg4[%c1_82, %c0_83, %c0_84] : memref<9x8x128xf32, #tpu.memory_space<vmem>>, vector<1x8x128xf32>
    %378 = vector.shape_cast %377 : vector<1x8x128xf32> to vector<8x128xf32>
    %379 = arith.mulf %376, %378 : vector<8x128xf32>
    %c4_85 = arith.constant 4 : index
    %c0_86 = arith.constant 0 : index
    %c0_87 = arith.constant 0 : index
    %380 = vector.load %arg4[%c4_85, %c0_86, %c0_87] : memref<9x8x128xf32, #tpu.memory_space<vmem>>, vector<1x8x128xf32>
    %381 = vector.shape_cast %380 : vector<1x8x128xf32> to vector<8x128xf32>
    %382 = arith.mulf %348, %381 : vector<8x128xf32>
    %383 = arith.addf %379, %382 : vector<8x128xf32>
    %c7_88 = arith.constant 7 : index
    %c0_89 = arith.constant 0 : index
    %c0_90 = arith.constant 0 : index
    %384 = vector.load %arg4[%c7_88, %c0_89, %c0_90] : memref<9x8x128xf32, #tpu.memory_space<vmem>>, vector<1x8x128xf32>
    %385 = vector.shape_cast %384 : vector<1x8x128xf32> to vector<8x128xf32>
    %386 = arith.mulf %346, %385 : vector<8x128xf32>
    %387 = arith.subf %383, %386 : vector<8x128xf32>
    %cst_91 = arith.constant 0.488602519 : f32
    %388 = vector.broadcast %cst_91 : f32 to vector<8x128xf32>
    %389 = arith.mulf %388, %387 : vector<8x128xf32>
    %390 = arith.addf %374, %389 : vector<8x128xf32>
    %cst_92 = arith.constant 5.000000e-01 : f32
    %391 = vector.broadcast %cst_92 : f32 to vector<8x128xf32>
    %392 = arith.addf %390, %391 : vector<8x128xf32>
    %c2_93 = arith.constant 2 : index
    %c0_94 = arith.constant 0 : index
    %c0_95 = arith.constant 0 : index
    %393 = vector.load %arg3[%c2_93, %c0_94, %c0_95] : memref<3x8x128xf32, #tpu.memory_space<vmem>>, vector<1x8x128xf32>
    %394 = vector.shape_cast %393 : vector<1x8x128xf32> to vector<8x128xf32>
    %cst_96 = arith.constant 0.282094806 : f32
    %395 = vector.broadcast %cst_96 : f32 to vector<8x128xf32>
    %396 = arith.mulf %395, %394 : vector<8x128xf32>
    %cst_97 = arith.constant 0.000000e+00 : f32
    %397 = vector.broadcast %cst_97 : f32 to vector<8x128xf32>
    %398 = arith.subf %397, %347 : vector<8x128xf32>
    %c2_98 = arith.constant 2 : index
    %c0_99 = arith.constant 0 : index
    %c0_100 = arith.constant 0 : index
    %399 = vector.load %arg4[%c2_98, %c0_99, %c0_100] : memref<9x8x128xf32, #tpu.memory_space<vmem>>, vector<1x8x128xf32>
    %400 = vector.shape_cast %399 : vector<1x8x128xf32> to vector<8x128xf32>
    %401 = arith.mulf %398, %400 : vector<8x128xf32>
    %c5_101 = arith.constant 5 : index
    %c0_102 = arith.constant 0 : index
    %c0_103 = arith.constant 0 : index
    %402 = vector.load %arg4[%c5_101, %c0_102, %c0_103] : memref<9x8x128xf32, #tpu.memory_space<vmem>>, vector<1x8x128xf32>
    %403 = vector.shape_cast %402 : vector<1x8x128xf32> to vector<8x128xf32>
    %404 = arith.mulf %348, %403 : vector<8x128xf32>
    %405 = arith.addf %401, %404 : vector<8x128xf32>
    %c8_104 = arith.constant 8 : index
    %c0_105 = arith.constant 0 : index
    %c0_106 = arith.constant 0 : index
    %406 = vector.load %arg4[%c8_104, %c0_105, %c0_106] : memref<9x8x128xf32, #tpu.memory_space<vmem>>, vector<1x8x128xf32>
    %407 = vector.shape_cast %406 : vector<1x8x128xf32> to vector<8x128xf32>
    %408 = arith.mulf %346, %407 : vector<8x128xf32>
    %409 = arith.subf %405, %408 : vector<8x128xf32>
    %cst_107 = arith.constant 0.488602519 : f32
    %410 = vector.broadcast %cst_107 : f32 to vector<8x128xf32>
    %411 = arith.mulf %410, %409 : vector<8x128xf32>
    %412 = arith.addf %396, %411 : vector<8x128xf32>
    %cst_108 = arith.constant 5.000000e-01 : f32
    %413 = vector.broadcast %cst_108 : f32 to vector<8x128xf32>
    %414 = arith.addf %412, %413 : vector<8x128xf32>
    %cst_109 = arith.constant 0.000000e+00 : f32
    %415 = vector.broadcast %cst_109 : f32 to vector<8x128xf32>
    %416 = arith.maximumf %370, %415 : vector<8x128xf32>
    %cst_110 = arith.constant 0.000000e+00 : f32
    %417 = vector.broadcast %cst_110 : f32 to vector<8x128xf32>
    %418 = arith.maximumf %392, %417 : vector<8x128xf32>
    %cst_111 = arith.constant 0.000000e+00 : f32
    %419 = vector.broadcast %cst_111 : f32 to vector<8x128xf32>
    %420 = arith.maximumf %414, %419 : vector<8x128xf32>
    %c1024_i32 = arith.constant 1024 : i32
    %421 = arith.muli %arg0, %c1024_i32 : i32
    %422 = tpu.iota {dimensions = array<i32: 0>} : vector<8x128xi32>
    %c128_i32 = arith.constant 128 : i32
    %423 = vector.broadcast %c128_i32 : i32 to vector<8x128xi32>
    %424 = arith.muli %422, %423 : vector<8x128xi32>
    %425 = vector.broadcast %421 : i32 to vector<8x128xi32>
    %426 = arith.addi %425, %424 : vector<8x128xi32>
    %427 = tpu.iota {dimensions = array<i32: 1>} : vector<8x128xi32>
    %428 = arith.addi %426, %427 : vector<8x128xi32>
    %429 = arith.sitofp %428 : vector<8x128xi32> to vector<8x128xf32>
    %430 = vector.broadcast %21 : f32 to vector<8x128xf32>
    %431 = arith.cmpf olt, %429, %430 : vector<8x128xf32>
    %cst_112 = arith.constant 2.000000e-01 : f32
    %432 = vector.broadcast %cst_112 : f32 to vector<8x128xf32>
    %433 = arith.cmpf ogt, %95, %432 : vector<8x128xf32>
    %cst_113 = arith.constant 0.000000e+00 : f32
    %434 = vector.broadcast %cst_113 : f32 to vector<8x128xf32>
    %435 = arith.cmpf ogt, %312, %434 : vector<8x128xf32>
    %436 = arith.andi %433, %435 : vector<8x128xi1>
    %437 = arith.andi %431, %436 : vector<8x128xi1>
    %cst_114 = arith.constant 0.000000e+00 : f32
    %438 = vector.broadcast %cst_114 : f32 to vector<8x128xf32>
    %c0_115 = arith.constant 0 : index
    %c0_116 = arith.constant 0 : index
    %c0_117 = arith.constant 0 : index
    %439 = vector.load %arg8[%c0_115, %c0_116, %c0_117] : memref<16x8x128xf32, #tpu.memory_space<vmem>>, vector<1x8x128xf32>
    %440 = vector.shape_cast %439 : vector<1x8x128xf32> to vector<8x128xf32>
    %441 = vector.shape_cast %101 : vector<8x128xf32> to vector<1x8x128xf32>
    tpu.vector_store %arg8[%c0_115, %c0_116, %c0_117], %441 {strides = array<i32>} : memref<16x8x128xf32, #tpu.memory_space<vmem>>, vector<1x8x128xf32>,
    %c1_118 = arith.constant 1 : index
    %c0_119 = arith.constant 0 : index
    %c0_120 = arith.constant 0 : index
    %442 = vector.load %arg8[%c1_118, %c0_119, %c0_120] : memref<16x8x128xf32, #tpu.memory_space<vmem>>, vector<1x8x128xf32>
    %443 = vector.shape_cast %442 : vector<1x8x128xf32> to vector<8x128xf32>
    %444 = vector.shape_cast %106 : vector<8x128xf32> to vector<1x8x128xf32>
    tpu.vector_store %arg8[%c1_118, %c0_119, %c0_120], %444 {strides = array<i32>} : memref<16x8x128xf32, #tpu.memory_space<vmem>>, vector<1x8x128xf32>,
    %c2_121 = arith.constant 2 : index
    %c0_122 = arith.constant 0 : index
    %c0_123 = arith.constant 0 : index
    %445 = vector.load %arg8[%c2_121, %c0_122, %c0_123] : memref<16x8x128xf32, #tpu.memory_space<vmem>>, vector<1x8x128xf32>
    %446 = vector.shape_cast %445 : vector<1x8x128xf32> to vector<8x128xf32>
    %447 = vector.shape_cast %95 : vector<8x128xf32> to vector<1x8x128xf32>
    tpu.vector_store %arg8[%c2_121, %c0_122, %c0_123], %447 {strides = array<i32>} : memref<16x8x128xf32, #tpu.memory_space<vmem>>, vector<1x8x128xf32>,
    %c3_124 = arith.constant 3 : index
    %c0_125 = arith.constant 0 : index
    %c0_126 = arith.constant 0 : index
    %448 = vector.load %arg8[%c3_124, %c0_125, %c0_126] : memref<16x8x128xf32, #tpu.memory_space<vmem>>, vector<1x8x128xf32>
    %449 = vector.shape_cast %448 : vector<1x8x128xf32> to vector<8x128xf32>
    %450 = vector.shape_cast %314 : vector<8x128xf32> to vector<1x8x128xf32>
    tpu.vector_store %arg8[%c3_124, %c0_125, %c0_126], %450 {strides = array<i32>} : memref<16x8x128xf32, #tpu.memory_space<vmem>>, vector<1x8x128xf32>,
    %c4_127 = arith.constant 4 : index
    %c0_128 = arith.constant 0 : index
    %c0_129 = arith.constant 0 : index
    %451 = vector.load %arg8[%c4_127, %c0_128, %c0_129] : memref<16x8x128xf32, #tpu.memory_space<vmem>>, vector<1x8x128xf32>
    %452 = vector.shape_cast %451 : vector<1x8x128xf32> to vector<8x128xf32>
    %453 = vector.shape_cast %317 : vector<8x128xf32> to vector<1x8x128xf32>
    tpu.vector_store %arg8[%c4_127, %c0_128, %c0_129], %453 {strides = array<i32>} : memref<16x8x128xf32, #tpu.memory_space<vmem>>, vector<1x8x128xf32>,
    %c5_130 = arith.constant 5 : index
    %c0_131 = arith.constant 0 : index
    %c0_132 = arith.constant 0 : index
    %454 = vector.load %arg8[%c5_130, %c0_131, %c0_132] : memref<16x8x128xf32, #tpu.memory_space<vmem>>, vector<1x8x128xf32>
    %455 = vector.shape_cast %454 : vector<1x8x128xf32> to vector<8x128xf32>
    %456 = vector.shape_cast %318 : vector<8x128xf32> to vector<1x8x128xf32>
    tpu.vector_store %arg8[%c5_130, %c0_131, %c0_132], %456 {strides = array<i32>} : memref<16x8x128xf32, #tpu.memory_space<vmem>>, vector<1x8x128xf32>,
    %c6_133 = arith.constant 6 : index
    %c0_134 = arith.constant 0 : index
    %c0_135 = arith.constant 0 : index
    %457 = vector.load %arg8[%c6_133, %c0_134, %c0_135] : memref<16x8x128xf32, #tpu.memory_space<vmem>>, vector<1x8x128xf32>
    %458 = vector.shape_cast %457 : vector<1x8x128xf32> to vector<8x128xf32>
    %459 = vector.shape_cast %416 : vector<8x128xf32> to vector<1x8x128xf32>
    tpu.vector_store %arg8[%c6_133, %c0_134, %c0_135], %459 {strides = array<i32>} : memref<16x8x128xf32, #tpu.memory_space<vmem>>, vector<1x8x128xf32>,
    %c7_136 = arith.constant 7 : index
    %c0_137 = arith.constant 0 : index
    %c0_138 = arith.constant 0 : index
    %460 = vector.load %arg8[%c7_136, %c0_137, %c0_138] : memref<16x8x128xf32, #tpu.memory_space<vmem>>, vector<1x8x128xf32>
    %461 = vector.shape_cast %460 : vector<1x8x128xf32> to vector<8x128xf32>
    %462 = vector.shape_cast %418 : vector<8x128xf32> to vector<1x8x128xf32>
    tpu.vector_store %arg8[%c7_136, %c0_137, %c0_138], %462 {strides = array<i32>} : memref<16x8x128xf32, #tpu.memory_space<vmem>>, vector<1x8x128xf32>,
    %c8_139 = arith.constant 8 : index
    %c0_140 = arith.constant 0 : index
    %c0_141 = arith.constant 0 : index
    %463 = vector.load %arg8[%c8_139, %c0_140, %c0_141] : memref<16x8x128xf32, #tpu.memory_space<vmem>>, vector<1x8x128xf32>
    %464 = vector.shape_cast %463 : vector<1x8x128xf32> to vector<8x128xf32>
    %465 = vector.shape_cast %420 : vector<8x128xf32> to vector<1x8x128xf32>
    tpu.vector_store %arg8[%c8_139, %c0_140, %c0_141], %465 {strides = array<i32>} : memref<16x8x128xf32, #tpu.memory_space<vmem>>, vector<1x8x128xf32>,
    %cst_142 = arith.constant 0.000000e+00 : f32
    %466 = vector.broadcast %cst_142 : f32 to vector<8x128xf32>
    %467 = arith.select %437, %34, %466 : vector<8x128xi1>, vector<8x128xf32>
    %c9_143 = arith.constant 9 : index
    %c0_144 = arith.constant 0 : index
    %c0_145 = arith.constant 0 : index
    %468 = vector.load %arg8[%c9_143, %c0_144, %c0_145] : memref<16x8x128xf32, #tpu.memory_space<vmem>>, vector<1x8x128xf32>
    %469 = vector.shape_cast %468 : vector<1x8x128xf32> to vector<8x128xf32>
    %470 = vector.shape_cast %467 : vector<8x128xf32> to vector<1x8x128xf32>
    tpu.vector_store %arg8[%c9_143, %c0_144, %c0_145], %470 {strides = array<i32>} : memref<16x8x128xf32, #tpu.memory_space<vmem>>, vector<1x8x128xf32>,
    %cst_146 = arith.constant -1.000000e+06 : f32
    %471 = vector.broadcast %cst_146 : f32 to vector<8x128xf32>
    %472 = arith.select %437, %331, %471 : vector<8x128xi1>, vector<8x128xf32>
    %c10_147 = arith.constant 10 : index
    %c0_148 = arith.constant 0 : index
    %c0_149 = arith.constant 0 : index
    %473 = vector.load %arg8[%c10_147, %c0_148, %c0_149] : memref<16x8x128xf32, #tpu.memory_space<vmem>>, vector<1x8x128xf32>
    %474 = vector.shape_cast %473 : vector<1x8x128xf32> to vector<8x128xf32>
    %475 = vector.shape_cast %472 : vector<8x128xf32> to vector<1x8x128xf32>
    tpu.vector_store %arg8[%c10_147, %c0_148, %c0_149], %475 {strides = array<i32>} : memref<16x8x128xf32, #tpu.memory_space<vmem>>, vector<1x8x128xf32>,
    %cst_150 = arith.constant 1.000000e+30 : f32
    %476 = vector.broadcast %cst_150 : f32 to vector<8x128xf32>
    %477 = arith.select %437, %95, %476 : vector<8x128xi1>, vector<8x128xf32>
    %c11_151 = arith.constant 11 : index
    %c0_152 = arith.constant 0 : index
    %c0_153 = arith.constant 0 : index
    %478 = vector.load %arg8[%c11_151, %c0_152, %c0_153] : memref<16x8x128xf32, #tpu.memory_space<vmem>>, vector<1x8x128xf32>
    %479 = vector.shape_cast %478 : vector<1x8x128xf32> to vector<8x128xf32>
    %480 = vector.shape_cast %477 : vector<8x128xf32> to vector<1x8x128xf32>
    tpu.vector_store %arg8[%c11_151, %c0_152, %c0_153], %480 {strides = array<i32>} : memref<16x8x128xf32, #tpu.memory_space<vmem>>, vector<1x8x128xf32>,
    %c12_154 = arith.constant 12 : index
    %c0_155 = arith.constant 0 : index
    %c0_156 = arith.constant 0 : index
    %481 = vector.load %arg8[%c12_154, %c0_155, %c0_156] : memref<16x8x128xf32, #tpu.memory_space<vmem>>, vector<1x8x128xf32>
    %482 = vector.shape_cast %481 : vector<1x8x128xf32> to vector<8x128xf32>
    %483 = vector.shape_cast %438 : vector<8x128xf32> to vector<1x8x128xf32>
    tpu.vector_store %arg8[%c12_154, %c0_155, %c0_156], %483 {strides = array<i32>} : memref<16x8x128xf32, #tpu.memory_space<vmem>>, vector<1x8x128xf32>,
    %c13_157 = arith.constant 13 : index
    %c0_158 = arith.constant 0 : index
    %c0_159 = arith.constant 0 : index
    %484 = vector.load %arg8[%c13_157, %c0_158, %c0_159] : memref<16x8x128xf32, #tpu.memory_space<vmem>>, vector<1x8x128xf32>
    %485 = vector.shape_cast %484 : vector<1x8x128xf32> to vector<8x128xf32>
    %486 = vector.shape_cast %438 : vector<8x128xf32> to vector<1x8x128xf32>
    tpu.vector_store %arg8[%c13_157, %c0_158, %c0_159], %486 {strides = array<i32>} : memref<16x8x128xf32, #tpu.memory_space<vmem>>, vector<1x8x128xf32>,
    %c14_160 = arith.constant 14 : index
    %c0_161 = arith.constant 0 : index
    %c0_162 = arith.constant 0 : index
    %487 = vector.load %arg8[%c14_160, %c0_161, %c0_162] : memref<16x8x128xf32, #tpu.memory_space<vmem>>, vector<1x8x128xf32>
    %488 = vector.shape_cast %487 : vector<1x8x128xf32> to vector<8x128xf32>
    %489 = vector.shape_cast %438 : vector<8x128xf32> to vector<1x8x128xf32>
    tpu.vector_store %arg8[%c14_160, %c0_161, %c0_162], %489 {strides = array<i32>} : memref<16x8x128xf32, #tpu.memory_space<vmem>>, vector<1x8x128xf32>,
    %c15_163 = arith.constant 15 : index
    %c0_164 = arith.constant 0 : index
    %c0_165 = arith.constant 0 : index
    %490 = vector.load %arg8[%c15_163, %c0_164, %c0_165] : memref<16x8x128xf32, #tpu.memory_space<vmem>>, vector<1x8x128xf32>
    %491 = vector.shape_cast %490 : vector<1x8x128xf32> to vector<8x128xf32>
    %492 = vector.shape_cast %438 : vector<8x128xf32> to vector<1x8x128xf32>
    tpu.vector_store %arg8[%c15_163, %c0_164, %c0_165], %492 {strides = array<i32>} : memref<16x8x128xf32, #tpu.memory_space<vmem>>, vector<1x8x128xf32>,
    return
  }
  func.func @transform_0(%arg0: i32) -> i32 {
    %c0_i32 = arith.constant 0 : i32
    %c0_i32_0 = arith.constant 0 : i32
    return %c0_i32 : i32
  }
  func.func @transform_1(%arg0: i32) -> (i32, i32, i32) {
    %c0_i32 = arith.constant 0 : i32
    %c0_i32_0 = arith.constant 0 : i32
    %c0_i32_1 = arith.constant 0 : i32
    return %c0_i32, %arg0, %c0_i32_0 : i32, i32, i32
  }
  func.func @transform_2(%arg0: i32) -> (i32, i32, i32) {
    %c0_i32 = arith.constant 0 : i32
    %c0_i32_0 = arith.constant 0 : i32
    %c0_i32_1 = arith.constant 0 : i32
    return %c0_i32, %arg0, %c0_i32_0 : i32, i32, i32
  }
  func.func @transform_3(%arg0: i32) -> (i32, i32, i32) {
    %c0_i32 = arith.constant 0 : i32
    %c0_i32_0 = arith.constant 0 : i32
    %c0_i32_1 = arith.constant 0 : i32
    return %c0_i32, %arg0, %c0_i32_0 : i32, i32, i32
  }
  func.func @transform_4(%arg0: i32) -> (i32, i32, i32) {
    %c0_i32 = arith.constant 0 : i32
    %c0_i32_0 = arith.constant 0 : i32
    %c0_i32_1 = arith.constant 0 : i32
    return %c0_i32, %arg0, %c0_i32_0 : i32, i32, i32
  }
  func.func @transform_5(%arg0: i32) -> (i32, i32, i32) {
    %c0_i32 = arith.constant 0 : i32
    %c0_i32_0 = arith.constant 0 : i32
    %c0_i32_1 = arith.constant 0 : i32
    return %c0_i32, %arg0, %c0_i32_0 : i32, i32, i32
  }
  func.func @transform_6(%arg0: i32) -> (i32, i32, i32) {
    %c0_i32 = arith.constant 0 : i32
    %c0_i32_0 = arith.constant 0 : i32
    %c0_i32_1 = arith.constant 0 : i32
    return %c0_i32, %arg0, %c0_i32_0 : i32, i32, i32
  }
  func.func @transform_7(%arg0: i32) -> (i32, i32, i32) {
    %c0_i32 = arith.constant 0 : i32
    %c0_i32_0 = arith.constant 0 : i32
    %c0_i32_1 = arith.constant 0 : i32
    return %c0_i32, %arg0, %c0_i32_0 : i32, i32, i32
  }
}

</mosaic_0001>

<bundles_post_ra>
// kernel: tpu_custom_call.1
= control target key start
LH: loop header
LB: loop body
LE: loop exit
PB: predicated region body
PF: predicated region fallthrough
CT: control target
= control target key end

     0   :  { %12 = vsyncpa [#allocation5], 0  ;;  %s1056_s0 = inlined_call_operand.hbm [shape: f32[23], index: 0, kind: input, shape index: {}]   ;;  %s1057_s1 = inlined_call_operand.hbm [shape: f32[3,8,128], index: 1, kind: input, shape index: {}]   ;;  %s1058_s2 = inlined_call_operand.hbm [shape: f32[3,8,128], index: 2, kind: input, shape index: {}]   ;;  %s1059_s3 = inlined_call_operand.hbm [shape: f32[9,8,128], index: 3, kind: input, shape index: {}]   ;;  %s1060_s4 = inlined_call_operand.hbm [shape: f32[1,8,128], index: 4, kind: input, shape index: {}]   ;;  %s1061_s5 = inlined_call_operand.hbm [shape: f32[3,8,128], index: 5, kind: input, shape index: {}]   ;;  %s1062_s6 = inlined_call_operand.hbm [shape: f32[4,8,128], index: 6, kind: input, shape index: {}]   ;;  %s1063_s7 = inlined_call_operand.hbm [shape: f32[16,8,128], index: 7, kind: output, shape index: {}]  }
   0x1   :  { %13 = vsyncpa [#allocation3], 0 }
   0x2   :  { %14 = vsyncpa [#allocation8], 0 }
   0x3   :  { %15 = vsyncpa [#allocation11], 0 }
   0x4   :  { %16 = vsyncpa [#allocation14], 0 }
   0x5   :  { %17 = vsyncpa [#allocation4], 0  ;;  %s789_s24 = smov [#allocation7]   ;;  %s790_s26 = smov [#allocation10]  }
   0x6   :  { %s43_s25 = sshll.u32 %s789_s24, 4  ;;  %s68_s27 = sshll.u32 %s790_s26, 4  ;;  %s44_s25 = int_to_ptr.vmem [resolvable:$true] %s43_s25  ;;  %s69_s27 = int_to_ptr.vmem [resolvable:$true] %s68_s27 }
   0x7   :  { %s637_s28 = scalar_lea.vmem %s44_s25, 384  ;;  %p642_p1 = scmp.lt.s32.totalorder %s44_s25, %s44_s25 }
   0x8   :  { %p638_p0 = scmp.ne.s32.totalorder %s44_s25, %s637_s28  ;;  %p643_p2 = scmp.lt.s32.totalorder %s637_s28, %s637_s28 }
   0xa   :  { %p644_p3 = por %p643_p2, %p642_p1 }
   0xc   :  { %p645_p4 = pnand %p644_p3, %p638_p0 }
   0xe   :  { %648 = shalt.err (!%p645_p4)
}
   0xf   :  { %s791_s29 = smov 128   ;;  %s792_s30 = smov 8  }
  0x10   :  { %49 = dma.hbm_to_vmem [thread:$0]  %s1058_s2, 384, %s44_s25, [#allocation8], %s791_s29, %s791_s29, %s792_s30  }
  0x11   :  { %s657_s10 = scalar_lea.vmem %s69_s27, 128  ;;  %p662_p6 = scmp.lt.s32.totalorder %s69_s27, %s69_s27 }
  0x12   :  { %p658_p5 = scmp.ne.s32.totalorder %s69_s27, %s657_s10  ;;  %p663_p7 = scmp.lt.s32.totalorder %s657_s10, %s657_s10 }
  0x14   :  { %p664_p8 = por %p663_p7, %p662_p6 }
  0x16   :  { %p665_p9 = pnand %p664_p8, %p658_p5 }
  0x18   :  { %668 = shalt.err (!%p665_p9)
}
  0x19   :  { %71 = dma.hbm_to_vmem [thread:$0]  %s1060_s4, 128, %s69_s27, [#allocation11]  }
  0x1a   :  { %s793_s13 = smov [#allocation2]   ;;  %s794_s16 = smov [#allocation6]  }
  0x1b   :  { %25 = dma.hbm_to_smem %s1056_s0, 16, %s793_s13, [#allocation5]  }
  0x1c   :  { %s31_s17 = sshll.u32 %s794_s16, 4  ;;  %s795_s2 = smov [#allocation9]   ;;  %s32_s17 = int_to_ptr.vmem [resolvable:$true] %s31_s17 }
  0x1d   :  { %s55_s18 = sshll.u32 %s795_s2, 4  ;;  %s685_s19 = scalar_lea.vmem %s32_s17, 384  ;;  %s56_s18 = int_to_ptr.vmem [resolvable:$true] %s55_s18 }
  0x1e   :  { %p686_p10 = scmp.ne.s32.totalorder %s32_s17, %s685_s19  ;;  %p690_p11 = scmp.lt.s32.totalorder %s32_s17, %s32_s17 }
  0x1f   :  { %p691_p12 = scmp.lt.s32.totalorder %s685_s19, %s685_s19 }
  0x21   :  { %p692_p13 = por %p691_p12, %p690_p11 }
  0x23   :  { %p693_p0 = pnand %p692_p13, %p686_p10 }
  0x25   :  { %696 = shalt.err (!%p693_p0)
}
  0x26   :  { %37 = dma.hbm_to_vmem [thread:$0]  %s1057_s1, 384, %s32_s17, [#allocation3], %s791_s29, %s791_s29, %s792_s30  }
  0x27   :  { %s705_s0 = scalar_lea.vmem %s56_s18, 1152  ;;  %p710_p2 = scmp.lt.s32.totalorder %s56_s18, %s56_s18 }
  0x28   :  { %p706_p1 = scmp.ne.s32.totalorder %s56_s18, %s705_s0  ;;  %p711_p3 = scmp.lt.s32.totalorder %s705_s0, %s705_s0 }
  0x2a   :  { %p712_p4 = por %p711_p3, %p710_p2 }
  0x2c   :  { %p713_p5 = pnand %p712_p4, %p706_p1 }
  0x2e   :  { %716 = shalt.err (!%p713_p5)
}
  0x2f   :  { %61 = dma.hbm_to_vmem [thread:$0]  %s1059_s3, 1152, %s56_s18, [#allocation8], %s791_s29, %s791_s29, %s792_s30  }
  0x30   :  { %s796_s23 = smov [#allocation12]   ;;  %s797_s25 = smov [#allocation13]  }
  0x31   :  { %s77_s24 = sshll.u32 %s796_s23, 4  ;;  %s89_s1 = sshll.u32 %s797_s25, 4  ;;  %s78_s24 = int_to_ptr.vmem [resolvable:$true] %s77_s24  ;;  %s90_s1 = int_to_ptr.vmem [resolvable:$true] %s89_s1 }
  0x32   :  { %s725_s26 = scalar_lea.vmem %s78_s24, 384  ;;  %p730_p7 = scmp.lt.s32.totalorder %s78_s24, %s78_s24 }
  0x33   :  { %p726_p6 = scmp.ne.s32.totalorder %s78_s24, %s725_s26  ;;  %p731_p8 = scmp.lt.s32.totalorder %s725_s26, %s725_s26 }
  0x35   :  { %p732_p9 = por %p731_p8, %p730_p7 }
  0x37   :  { %p733_p10 = pnand %p732_p9, %p726_p6 }
  0x39   :  { %736 = shalt.err (!%p733_p10)
}
  0x3a   :  { %83 = dma.hbm_to_vmem [thread:$0]  %s1061_s5, 384, %s78_s24, [#allocation11], %s791_s29, %s791_s29, %s792_s30  }
  0x3b   :  { %s745_s3 = scalar_lea.vmem %s90_s1, 512  ;;  %p750_p12 = scmp.lt.s32.totalorder %s90_s1, %s90_s1 }
  0x3c   :  { %p746_p11 = scmp.ne.s32.totalorder %s90_s1, %s745_s3  ;;  %p751_p13 = scmp.lt.s32.totalorder %s745_s3, %s745_s3 }
  0x3e   :  { %p752_p0 = por %p751_p13, %p750_p12 }
  0x40   :  { %p753_p1 = pnand %p752_p0, %p746_p11 }
  0x42   :  { %756 = shalt.err (!%p753_p1)
}
  0x43   :  { %95 = dma.hbm_to_vmem [thread:$0]  %s1062_s6, 512, %s90_s1, [#allocation14], %s791_s29, %s791_s29, %s792_s30  }
  0x44   :  { %777 = dma.done.wait [#allocation5], 16  }
  0x45   :  { %778 = vsyncadd [#allocation5], 4294967280 }
  0x46   :  { %779 = dma.done.wait [#allocation3], 384  }
  0x47   :  { %780 = vsyncadd [#allocation3], 4294966912 }
  0x48   :  { %781 = dma.done.wait [#allocation8], 1536  }
  0x49   :  { %782 = vsyncadd [#allocation8], 4294965760 }
  0x4a   :  { %783 = dma.done.wait [#allocation11], 512  }
  0x4b   :  { %784 = vsyncadd [#allocation11], 4294966784 }
  0x4c   :  { %785 = dma.done.wait [#allocation14], 512  }
  0x4d   :  { %786 = vsyncadd [#allocation14], 4294966784 }
  0x4e   :  { %117 = sfence }
  0x4f   :  { %s876_s5 = sld [smem:[#allocation2]]  ;;  %v140_v0 = vld [vmem:[#allocation6] sm:$0xff]  ;;  %v142_v1 = vld [vmem:[#allocation6 + $0x8] sm:$0xff]  ;;  %v144_v2 = vld [vmem:[#allocation6 + $0x10] sm:$0xff] }
  0x50   :  { %s878_s10 = sld [smem:[#allocation2 + $0x1]]  ;;  %v941_v44 = vld [vmem:[#allocation13] sm:$0xff]  ;;  %v943_v45 = vld [vmem:[#allocation13 + $0x8] sm:$0xff]  ;;  %v954_v57 = vld [vmem:[#allocation13 + $0x10] sm:$0xff] }
  0x51   :  { %s880_s11 = sld [smem:[#allocation2 + $0x3]]  ;;  %v170_v52 = vmul.f32 %v941_v44, %v941_v44  ;;  %v171_v53 = vmul.f32 %v943_v45, %v943_v45 }
  0x52   :  { %s882_s6 = sld [smem:[#allocation2 + $0x4]] }
  0x53   :  { %s571_s12 = sld [smem:[#allocation2 + $0x6]]  ;;  %v172_v63 = vadd.f32 %v171_v53, %v170_v52 }
  0x54   :  { %s572_s13 = sld [smem:[#allocation2 + $0x7]] }
  0x55   :  { %s573_s14 = sld [smem:[#allocation2 + $0x8]]  ;;  %v183_v6 = vstv %s876_s5 }
  0x56   :  { %s884_s15 = sld [smem:[#allocation2 + $0x2]]  ;;  %v185_v7 = vstv %s878_s10  ;;  %v184_v14 = vmul.f32 %v183_v6, %v140_v0 }
  0x57   :  { %s886_s16 = sld [smem:[#allocation2 + $0x5]]  ;;  %v193_v10 = vstv %s880_s11  ;;  %v186_v15 = vmul.f32 %v185_v7, %v142_v1 }
  0x58   :  { %s576_s17 = sld [smem:[#allocation2 + $0xb]]  ;;  %v195_v11 = vstv %s882_s6  ;;  %v194_v18 = vmul.f32 %v193_v10, %v140_v0 }
  0x59   :  { %v888_v3 = vstv %s571_s12  ;;  %s893_s2 = sld [smem:[#allocation2 + $0x9]]  ;;  %v196_v19 = vmul.f32 %v195_v11, %v142_v1  ;;  %v187_v24 = vadd.f32 %v186_v15, %v184_v14 }
  0x5a   :  { %v204_v4 = vmul.f32 %v888_v3, %v140_v0  ;;  %v891_v5 = vstv %s572_s13  ;;  %s900_s18 = sld [smem:[#allocation2 + $0xf]] }
  0x5b   :  { %v206_v8 = vmul.f32 %v891_v5, %v142_v1  ;;  %v898_v9 = vstv %s573_s14  ;;  %s905_s19 = sld [smem:[#allocation2 + $0x10]]  ;;  %v197_v25 = vadd.f32 %v196_v19, %v194_v18  ;;  %s799_s14 = smov [#allocation15]  }
  0x5c   :  { %v209_v12 = vmul.f32 %v898_v9, %v144_v2  ;;  %s907_s4 = sld [smem:[#allocation2 + $0xc]]  ;;  %v188_v17 = vstv %s884_s15  ;;  %s550_s15 = sshll.u32 %s799_s14, 4  ;;  %s551_s15 = int_to_ptr.vmem [resolvable:$true] %s550_s15 }
  0x5d   :  { %v207_v13 = vadd.f32 %v206_v8, %v204_v4  ;;  %s578_s20 = sld [smem:[#allocation2 + $0xd]]  ;;  %v198_v21 = vstv %s886_s16  ;;  %v189_v23 = vmul.f32 %v188_v17, %v144_v2  ;;  %s757_s16 = scalar_lea.vmem %s551_s15, 2048 }
  0x5e   :  { %v211_v16 = vstv %s576_s17  ;;  %s575_s0 = sld [smem:[#allocation2 + $0xa]]  ;;  %v199_v26 = vmul.f32 %v198_v21, %v144_v2  ;;  %p758_p2 = scmp.ne.s32.totalorder %s551_s15, %s757_s16 }
  0x5f   :  { %v210_v20 = vadd.f32 %v209_v12, %v207_v13  ;;  %s579_s22 = sld [smem:[#allocation2 + $0xe]]  ;;  %v190_v29 = vadd.f32 %v189_v23, %v187_v24  ;;  %v191_v33 = vstv %s893_s2  ;;  %p762_p3 = scmp.lt.s32.totalorder %s551_s15, %s551_s15 }
  0x60   :  { %s293_s21 = smul.f32 2.0, %s900_s18  ;;  %s929_s24 = sld [smem:[#allocation2 + $0x11]]  ;;  %v200_v30 = vadd.f32 %v199_v26, %v197_v25  ;;  %v214_v40 = vstv %s900_s18  ;;  %v798_v26 = vmov 0.0  }
  0x61   :  { %v919_v22 = vadd.f32 %v211_v16, %v210_v20  ;;  %s298_s23 = smul.f32 2.0, %s905_s19  ;;  %s583_s25 = sld [smem:[#allocation2 + $0x12]]  ;;  %v933_v37 = vadd.f32 %v191_v33, %v190_v29  ;;  %v219_v41 = vstv %s905_s19  ;;  %538 = vst [vmem:[#allocation15 + $0x60] sm:$0xff] %v798_v26  ;;  %540 = vst [vmem:[#allocation15 + $0x68] sm:$0xff] %v798_v26  ;;  %v479_v33 = vld [vmem:[#allocation9 + $0x10] sm:$0xff] }
  0x62   :  { %v294_v27 = vstv %s293_s21  ;;  %v426_v31 = vstv %s907_s4  ;;  %542 = vst [vmem:[#allocation15 + $0x70] sm:$0xff] %v798_v26  ;;  %544 = vst [vmem:[#allocation15 + $0x78] sm:$0xff] %v798_v26  ;;  %s992_s1 = sld [smem:[#allocation2 + $0x13]]  ;;  %p763_p4 = scmp.lt.s32.totalorder %s757_s16, %s757_s16 }
  0x63   :  { %603 = vrcp.f32 %v919_v22  ;;  %515 = vst [vmem:[#allocation15 + $0x10] sm:$0xff] %v919_v22  ;;  %v299_v28 = vstv %s298_s23  ;;  %v428_v32 = vstv %s578_s20  ;;  %v427_v35 = vsub.f32 %v140_v0, %v426_v31  ;;  %v469_v31 = vld [vmem:[#allocation9 + $0x38] sm:$0xff]  ;;  %s994_s26 = sld [smem:[#allocation2 + $0x14]] }
  0x64   :  { %605 = vrcp.f32 %v294_v27  ;;  %v201_v34 = vstv %s575_s0  ;;  %v429_v36 = vsub.f32 %v142_v1, %v428_v32  ;;  %v215_v42 = vmul.f32 %v214_v40, %v933_v37  ;;  %v958_v1 = vld [vmem:[#allocation13 + $0x18] sm:$0xff]  ;;  %v462_v32 = vld [vmem:[#allocation9 + $0x8] sm:$0xff]  ;;  %s320_s28 = ssub.f32 0.0, %s900_s18  ;;  %p764_p5 = por %p763_p4, %p762_p3 }
  0x65   :  { %607 = vrcp.f32 %v299_v28  ;;  %v935_v38 = vadd.f32 %v201_v34, %v200_v30  ;;  %v430_v39 = vstv %s579_s22  ;;  %v432_v47 = vmul.f32 %v427_v35, %v427_v35  ;;  %v465_v27 = vld [vmem:[#allocation9 + $0x20] sm:$0xff]  ;;  %v452_v30 = vld [vmem:[#allocation9 + $0x30] sm:$0xff]  ;;  %s326_s5 = ssub.f32 0.0, %s905_s19 }
  0x66   :  { %v431_v46 = vsub.f32 %v144_v2, %v430_v39  ;;  %v433_v48 = vmul.f32 %v429_v36, %v429_v36  ;;  %v217_v50 = vstv %s929_s24  ;;  %v173_v0 = vmul.f32 %v954_v57, %v954_v57  ;;  %s586_s13 = sld [smem:[#allocation2 + $0x15]]  ;;  %p765_p6 = pnand %p764_p5, %p758_p2 }
  0x67   :  { %v220_v43 = vmul.f32 %v219_v41, %v935_v38  ;;  %v222_v51 = vstv %s583_s25  ;;  %v175_v8 = vmul.f32 %v958_v1, %v958_v1  ;;  %vm507_vm0 = vcmp.gt.f32.partialorder %v919_v22, 0.2 }
  0x68   :  { %v434_v58 = vadd.f32 %v433_v48, %v432_v47  ;;  %v435_v59 = vmul.f32 %v431_v46, %v431_v46  ;;  %v174_v4 = vadd.f32 %v173_v0, %v172_v63  ;;  %v152_v47 = vld [vmem:[#allocation12] sm:$0xff]  ;;  %v442_v48 = vld [vmem:[#allocation7] sm:$0xff] }
  0x6a   :  { %v436_v2 = vadd.f32 %v435_v59, %v434_v58  ;;  %v176_v13 = vadd.f32 %v175_v8, %v174_v4  ;;  %v153_v59 = vmul.f32 1.442695, %v152_v47 }
  0x6c   :  { %v437_v12 = vadd.f32 1e-12, %v436_v2  ;;  %v177_v20 = vadd.f32 1e-12, %v176_v13 }
  0x6e   :  { %609 = vrsqrt.f32 %v437_v12 }
  0x6f   :  { %611 = vrsqrt.f32 %v177_v20 }
  0x70   :  { %v945_v49 = vpop.eup %603  ;;  %613 = vpow2.f32 %v153_v59 }
  0x71   :  { %v216_v54 = vmul.f32 %v945_v49, %v215_v42  ;;  %v221_v55 = vmul.f32 %v945_v49, %v220_v43  ;;  %v606_v56 = vpop.eup %605  ;;  %v319_v14 = vmul.f32 %v945_v49, %v214_v40  ;;  %v325_v15 = vmul.f32 %v945_v49, %v219_v41 }
  0x72   :  { %v608_v60 = vpop.eup %607  ;;  %588 = vpush %v606_v56 }
  0x73   :  { %v218_v61 = vadd.f32 %v217_v50, %v216_v54  ;;  %v223_v62 = vadd.f32 %v222_v51, %v221_v55  ;;  %590 = vpush %v608_v60  ;;  %v966_v16 = vmul.f32 %v319_v14, %v183_v6  ;;  %v970_v18 = vmul.f32 %v319_v14, %v185_v7  ;;  %v445_v7 = vld [vmem:[#allocation9] sm:$0xff]  ;;  %v459_v51 = vld [vmem:[#allocation7 + $0x8] sm:$0xff]  ;;  %v156_v54 = vld [vmem:[#allocation12 + $0x8] sm:$0xff] }
  0x74   :  { %v974_v19 = vmul.f32 %v319_v14, %v188_v17  ;;  %v978_v23 = vmul.f32 %v325_v15, %v193_v10  ;;  %v982_v24 = vmul.f32 %v325_v15, %v195_v11  ;;  %v986_v25 = vmul.f32 %v325_v15, %v198_v21  ;;  %v448_v17 = vld [vmem:[#allocation9 + $0x18] sm:$0xff]  ;;  %v482_v11 = vld [vmem:[#allocation9 + $0x28] sm:$0xff]  ;;  %v486_v21 = vld [vmem:[#allocation9 + $0x40] sm:$0xff] }
  0x75   :  { %511 = vst [vmem:[#allocation15] sm:$0xff] %v218_v61  ;;  %513 = vst [vmem:[#allocation15 + $0x8] sm:$0xff] %v223_v62  ;;  %v443_v60 = vmul.f32 0.2820948, %v442_v48  ;;  %v460_v61 = vmul.f32 0.2820948, %v459_v51 }
  0x76   :  { %v160_v62 = vld [vmem:[#allocation12 + $0x10] sm:$0xff]  ;;  %v157_v8 = vmul.f32 1.442695, %v156_v54  ;;  %v145_v48 = vld [vmem:[#allocation10] sm:$0xff] }
  0x77   :  { %v161_v26 = vmul.f32 1.442695, %v160_v62 }
  0x78   :  { %615 = vpow2.f32 %v157_v8  ;;  %v305_v8 = vmul.f32 %v945_v49, %v933_v37 }
  0x79   :  { %617 = vpow2.f32 %v161_v26 }
  0x7b   :  { %v610_v6 = vpop.eup %609 }
  0x7c   :  { %v439_v28 = vmul.f32 %v610_v6, %v427_v35  ;;  %v440_v29 = vmul.f32 %v610_v6, %v429_v36  ;;  %v441_v10 = vmul.f32 %v610_v6, %v431_v46  ;;  %v476_v46 = vld [vmem:[#allocation7 + $0x10] sm:$0xff]  ;;  %v612_v53 = vpop.eup %611 }
  0x7d   :  { %v477_v2 = vmul.f32 0.2820948, %v476_v46  ;;  %v181_v12 = vmul.f32 %v612_v53, %v954_v57  ;;  %v182_v13 = vmul.f32 %v612_v53, %v958_v1  ;;  %v180_v6 = vmul.f32 %v612_v53, %v943_v45  ;;  %v614_v54 = vpop.eup %613 }
  0x7e   :  { %v444_v34 = vsub.f32 0.0, %v440_v29  ;;  %v449_v39 = vmul.f32 %v448_v17, %v441_v10  ;;  %v466_v40 = vmul.f32 %v465_v27, %v441_v10  ;;  %v453_v41 = vmul.f32 %v452_v30, %v439_v28 }
  0x7f   :  { %v470_v42 = vmul.f32 %v469_v31, %v439_v28  ;;  %v483_v43 = vmul.f32 %v482_v11, %v441_v10  ;;  %v487_v36 = vmul.f32 %v486_v21, %v439_v28  ;;  %v179_v28 = vmul.f32 %v612_v53, %v941_v44 }
  0x80   :  { %v446_v50 = vmul.f32 %v445_v7, %v444_v34  ;;  %v463_v52 = vmul.f32 %v462_v32, %v444_v34  ;;  %v480_v35 = vmul.f32 %v479_v33, %v444_v34  ;;  %v224_v29 = vmul.f32 %v181_v12, %v181_v12 }
  0x81   :  { %v225_v10 = vmul.f32 %v182_v13, %v182_v13  ;;  %v239_v11 = vmul.f32 %v180_v6, %v180_v6  ;;  %v229_v21 = vmul.f32 %v181_v12, %v180_v6  ;;  %v230_v34 = vmul.f32 %v182_v13, %v179_v28 }
  0x82   :  { %v450_v55 = vadd.f32 %v449_v39, %v446_v50  ;;  %v467_v56 = vadd.f32 %v466_v40, %v463_v52  ;;  %v484_v58 = vadd.f32 %v483_v43, %v480_v35  ;;  %v233_v39 = vmul.f32 %v182_v13, %v180_v6 }
  0x83   :  { %v226_v45 = vadd.f32 %v225_v10, %v224_v29  ;;  %v234_v44 = vmul.f32 %v181_v12, %v179_v28  ;;  %v240_v40 = vadd.f32 %v239_v11, %v225_v10  ;;  %v231_v47 = vsub.f32 %v229_v21, %v230_v34 }
  0x84   :  { %v454_v63 = vsub.f32 %v450_v55, %v453_v41  ;;  %v471_v0 = vsub.f32 %v467_v56, %v470_v42  ;;  %v488_v4 = vsub.f32 %v484_v58, %v487_v36  ;;  %v243_v41 = vmul.f32 %v182_v13, %v181_v12 }
  0x85   :  { %v244_v42 = vmul.f32 %v180_v6, %v179_v28  ;;  %v227_v43 = vmul.f32 2.0, %v226_v45  ;;  %v237_v50 = vadd.f32 %v230_v34, %v229_v21  ;;  %v251_v51 = vadd.f32 %v239_v11, %v224_v29  ;;  %v616_v59 = vpop.eup %615 }
  0x86   :  { %v455_v14 = vmul.f32 0.48860252, %v454_v63  ;;  %v472_v15 = vmul.f32 0.48860252, %v471_v0  ;;  %v489_v20 = vmul.f32 0.48860252, %v488_v4  ;;  %v247_v35 = vsub.f32 %v233_v39, %v234_v44  ;;  %v618_v13 = vpop.eup %617 }
  0x87   :  { %v241_v52 = vmul.f32 2.0, %v240_v40  ;;  %v249_v36 = vadd.f32 %v244_v42, %v243_v41  ;;  %v235_v46 = vadd.f32 %v234_v44, %v233_v39  ;;  %v245_v53 = vsub.f32 %v243_v41, %v244_v42 }
  0x88   :  { %v456_v7 = vadd.f32 %v455_v14, %v443_v60  ;;  %v473_v17 = vadd.f32 %v472_v15, %v460_v61  ;;  %v490_v27 = vadd.f32 %v489_v20, %v477_v2  ;;  %v587_v55 = vmul.f32 -1.442695, %v145_v48 }
  0x89   :  { %v228_v56 = vsub.f32 1.0, %v227_v43  ;;  %v232_v58 = vmul.f32 2.0, %v231_v47  ;;  %v238_v60 = vmul.f32 2.0, %v237_v50  ;;  %v252_v61 = vmul.f32 2.0, %v251_v51 }
  0x8a   :  { %v457_v30 = vadd.f32 0.5, %v456_v7  ;;  %v474_v31 = vadd.f32 0.5, %v473_v17  ;;  %v491_v57 = vadd.f32 0.5, %v490_v27  ;;  %v242_v62 = vsub.f32 1.0, %v241_v52 }
  0x8b   :  { %v248_v63 = vmul.f32 2.0, %v247_v35  ;;  %v250_v0 = vmul.f32 2.0, %v249_v36  ;;  %v236_v2 = vmul.f32 2.0, %v235_v46  ;;  %v246_v4 = vmul.f32 2.0, %v245_v53 }
  0x8c   :  { %v492_v1 = vmax.f32 %v457_v30, 0.0  ;;  %v493_v32 = vmax.f32 %v474_v31, 0.0  ;;  %v494_v33 = vmax.f32 %v491_v57, 0.0  ;;  %v496_v12 = vlaneseq }
  0x8d   :  { %619 = vpow2.f32 %v587_v55  ;;  %v254_v14 = vmul.f32 %v614_v54, %v228_v56  ;;  %v255_v15 = vmul.f32 %v616_v59, %v232_v58  ;;  %v312_v20 = vmul.f32 %v945_v49, %v935_v38 }
  0x8e   :  { %523 = vst [vmem:[#allocation15 + $0x30] sm:$0xff] %v492_v1  ;;  %525 = vst [vmem:[#allocation15 + $0x38] sm:$0xff] %v493_v32  ;;  %v253_v26 = vsub.f32 1.0, %v252_v61  ;;  %v257_v6 = vmul.f32 %v614_v54, %v238_v60  ;;  %v321_v7 = vstv %s320_s28  ;;  %v327_v17 = vstv %s326_s5 }
  0x8f   :  { %527 = vst [vmem:[#allocation15 + $0x40] sm:$0xff] %v494_v33  ;;  %v258_v27 = vmul.f32 %v616_v59, %v242_v62  ;;  %v260_v28 = vmul.f32 %v614_v54, %v248_v63  ;;  %v261_v37 = vmul.f32 %v616_v59, %v250_v0  ;;  %v256_v10 = vmul.f32 %v618_v13, %v236_v2 }
  0x90   :  { %v259_v30 = vmul.f32 %v618_v13, %v246_v4  ;;  %v263_v11 = vmul.f32 %v254_v14, %v254_v14  ;;  %v264_v1 = vmul.f32 %v255_v15, %v255_v15  ;;  %v262_v33 = vmul.f32 %v618_v13, %v253_v26 }
  0x91   :  { %v268_v45 = vmul.f32 %v257_v6, %v254_v14  ;;  %v269_v39 = vmul.f32 %v258_v27, %v255_v15  ;;  %v273_v44 = vmul.f32 %v260_v28, %v254_v14  ;;  %v274_v40 = vmul.f32 %v261_v37, %v255_v15 }
  0x92   :  { %v266_v42 = vmul.f32 %v256_v10, %v256_v10  ;;  %v278_v43 = vmul.f32 %v257_v6, %v257_v6  ;;  %v279_v47 = vmul.f32 %v258_v27, %v258_v27  ;;  %v265_v50 = vadd.f32 %v264_v1, %v263_v11 }
  0x93   :  { %v283_v51 = vmul.f32 %v260_v28, %v257_v6  ;;  %v284_v52 = vmul.f32 %v261_v37, %v258_v27  ;;  %v271_v36 = vmul.f32 %v259_v30, %v256_v10  ;;  %v288_v46 = vmul.f32 %v260_v28, %v260_v28 }
  0x94   :  { %v289_v53 = vmul.f32 %v261_v37, %v261_v37  ;;  %v270_v55 = vadd.f32 %v269_v39, %v268_v45  ;;  %v275_v56 = vadd.f32 %v274_v40, %v273_v44  ;;  %v276_v58 = vmul.f32 %v262_v33, %v256_v10 }
  0x95   :  { %v280_v60 = vadd.f32 %v279_v47, %v278_v43  ;;  %v281_v61 = vmul.f32 %v259_v30, %v259_v30  ;;  %v285_v63 = vadd.f32 %v284_v52, %v283_v51  ;;  %v286_v0 = vmul.f32 %v262_v33, %v259_v30 }
  0x96   :  { %v1018_v4 = vshrl.u32 %v496_v12, 7  ;;  %v290_v13 = vadd.f32 %v289_v53, %v288_v46  ;;  %v291_v14 = vmul.f32 %v262_v33, %v262_v33  ;;  %v267_v26 = vadd.f32 %v266_v42, %v265_v50 }
  0x97   :  { %v272_v6 = vadd.f32 %v271_v36, %v270_v55  ;;  %v282_v27 = vadd.f32 %v281_v61, %v280_v60  ;;  %v287_v10 = vadd.f32 %v286_v0, %v285_v63 }
  0xa3   :  { %s589_s27 = spop %588 }
  0xa4   :  { %s297_s3 = smul.f32 %s589_s27, %s992_s1  ;;  %s591_s8 = spop %590 }
  0xa5   :  { %s302_s9 = smul.f32 %s591_s8, %s994_s26 }
  0xa6   :  { %s1000_s10 = smul.f32 1.3, %s297_s3 }
  0xa7   :  { %s1002_s11 = smul.f32 1.3, %s302_s9 }
  0xa8   :  { %s306_s6 = ssub.f32 0.0, %s1000_s10  ;;  %v309_v32 = vstv %s1000_s10 }
  0xa9   :  { %s313_s12 = ssub.f32 0.0, %s1002_s11  ;;  %v316_v34 = vstv %s1002_s11 }
  0xaa   :  { %v307_v29 = vstv %s306_s6 }
  0xab   :  { %v308_v31 = vmax.f32 %v307_v29, %v305_v8  ;;  %v314_v57 = vstv %s313_s12  ;;  %v620_v8 = vpop.eup %619 }
  0xac   :  { %v315_v38 = vmax.f32 %v314_v57, %v312_v20  ;;  %v1021_v20 = vand.u32 127, %v496_v12  ;;  %v292_v57 = vadd.f32 %v291_v14, %v290_v13  ;;  %v498_v13 = vmul.u32 128, %v1018_v4 }
  0xad   :  { %v310_v21 = vmin.f32 %v309_v32, %v308_v31  ;;  %v149_v32 = vadd.f32 1.0, %v620_v8 }
  0xae   :  { %v317_v41 = vmin.f32 %v316_v34, %v315_v38 }
  0xaf   :  { %v311_v48 = vmul.f32 %v310_v21, %v919_v22  ;;  %621 = vrcp.f32 %v149_v32 }
  0xb0   :  { %v318_v35 = vmul.f32 %v317_v41, %v919_v22 }
  0xb1   :  { %v322_v54 = vmul.f32 %v321_v7, %v311_v48  ;;  %v277_v7 = vadd.f32 %v276_v58, %v275_v56 }
  0xb2   :  { %v328_v59 = vmul.f32 %v327_v17, %v318_v35 }
  0xb3   :  { %v323_v62 = vmul.f32 %v945_v49, %v322_v54 }
  0xb4   :  { %v329_v2 = vmul.f32 %v945_v49, %v328_v59 }
  0xb5   :  { %v324_v15 = vmul.f32 %v945_v49, %v323_v62 }
  0xb6   :  { %v330_v17 = vmul.f32 %v945_v49, %v329_v2 }
  0xb7   :  { %v332_v28 = vmul.f32 %v324_v15, %v888_v3  ;;  %v335_v37 = vmul.f32 %v324_v15, %v891_v5  ;;  %v338_v29 = vmul.f32 %v324_v15, %v898_v9 }
  0xb8   :  { %v341_v30 = vmul.f32 %v330_v17, %v888_v3  ;;  %v344_v31 = vmul.f32 %v330_v17, %v891_v5  ;;  %v347_v12 = vmul.f32 %v330_v17, %v898_v9 }
  0xb9   :  { %v333_v11 = vadd.f32 %v332_v28, %v966_v16  ;;  %v336_v1 = vadd.f32 %v335_v37, %v970_v18  ;;  %v339_v49 = vadd.f32 %v338_v29, %v974_v19 }
  0xba   :  { %v342_v38 = vadd.f32 %v341_v30, %v978_v23  ;;  %v345_v33 = vadd.f32 %v344_v31, %v982_v24  ;;  %v348_v45 = vadd.f32 %v347_v12, %v986_v25 }
  0xbb   :  { %v349_v21 = vmul.f32 %v333_v11, %v267_v26  ;;  %v350_v3 = vmul.f32 %v336_v1, %v272_v6  ;;  %v352_v34 = vmul.f32 %v339_v49, %v277_v7  ;;  %v354_v5 = vmul.f32 %v333_v11, %v272_v6 }
  0xbc   :  { %v355_v39 = vmul.f32 %v336_v1, %v282_v27  ;;  %v357_v9 = vmul.f32 %v339_v49, %v287_v10  ;;  %v359_v44 = vmul.f32 %v333_v11, %v277_v7  ;;  %v360_v40 = vmul.f32 %v336_v1, %v287_v10  ;;  %v622_v4 = vpop.eup %621 }
  0xbd   :  { %v351_v16 = vadd.f32 %v350_v3, %v349_v21  ;;  %v362_v41 = vmul.f32 %v339_v49, %v292_v57  ;;  %v364_v18 = vmul.f32 %v342_v38, %v267_v26  ;;  %v365_v42 = vmul.f32 %v345_v33, %v272_v6 }
  0xbe   :  { %v356_v19 = vadd.f32 %v355_v39, %v354_v5  ;;  %v361_v43 = vadd.f32 %v360_v40, %v359_v44  ;;  %v367_v47 = vmul.f32 %v348_v45, %v277_v7  ;;  %v369_v23 = vmul.f32 %v342_v38, %v272_v6 }
  0xbf   :  { %v353_v48 = vadd.f32 %v352_v34, %v351_v16  ;;  %v366_v24 = vadd.f32 %v365_v42, %v364_v18  ;;  %v370_v50 = vmul.f32 %v345_v33, %v282_v27  ;;  %v372_v25 = vmul.f32 %v348_v45, %v287_v10 }
  0xc0   :  { %v358_v51 = vadd.f32 %v357_v9, %v356_v19  ;;  %v363_v52 = vadd.f32 %v362_v41, %v361_v43  ;;  %v374_v35 = vmul.f32 %v342_v38, %v277_v7  ;;  %v375_v36 = vmul.f32 %v345_v33, %v287_v10 }
  0xc1   :  { %v368_v46 = vadd.f32 %v367_v47, %v366_v24  ;;  %v371_v53 = vadd.f32 %v370_v50, %v369_v23  ;;  %v377_v54 = vmul.f32 %v348_v45, %v292_v57  ;;  %v379_v55 = vmul.f32 %v353_v48, %v333_v11 }
  0xc2   :  { %v376_v56 = vadd.f32 %v375_v36, %v374_v35  ;;  %v380_v58 = vmul.f32 %v358_v51, %v336_v1  ;;  %v382_v59 = vmul.f32 %v363_v52, %v339_v49  ;;  %v385_v60 = vmul.f32 %v353_v48, %v342_v38 }
  0xc3   :  { %v373_v61 = vadd.f32 %v372_v25, %v371_v53  ;;  %v386_v62 = vmul.f32 %v358_v51, %v345_v33  ;;  %v388_v63 = vmul.f32 %v363_v52, %v348_v45  ;;  %v390_v0 = vmul.f32 %v368_v46, %v342_v38 }
  0xc4   :  { %v378_v2 = vadd.f32 %v377_v54, %v376_v56  ;;  %v381_v8 = vadd.f32 %v380_v58, %v379_v55  ;;  %v503_v27 = vadd.s32 %v1021_v20, %v498_v13  ;;  %v505_v57 = vstv %s586_s13 }
  0xc5   :  { %v387_v14 = vadd.f32 %v386_v62, %v385_v60  ;;  %v391_v15 = vmul.f32 %v373_v61, %v345_v33 }
  0xc6   :  { %v383_v26 = vadd.f32 %v382_v59, %v381_v8  ;;  %v393_v6 = vmul.f32 %v378_v2, %v348_v45  ;;  %v504_v10 = vcvt.s32.f32 %v503_v27 }
  0xc7   :  { %v389_v7 = vadd.f32 %v388_v63, %v387_v14  ;;  %v392_v17 = vadd.f32 %v391_v15, %v390_v0 }
  0xc8   :  { %v384_v28 = vadd.f32 0.3, %v383_v26  ;;  %vm506_vm1 = vcmp.lt.f32.partialorder %v504_v10, %v505_v57 }
  0xc9   :  { %v394_v37 = vadd.f32 %v393_v6, %v392_v17  ;;  %v397_v31 = vmul.f32 %v389_v7, %v389_v7  ;;  %v401_v21 = vsub.f32 0.0, %v389_v7 }
  0xcb   :  { %v395_v29 = vadd.f32 0.3, %v394_v37 }
  0xcd   :  { %v396_v30 = vmul.f32 %v395_v29, %v384_v28  ;;  %v404_v12 = vadd.f32 %v395_v29, %v384_v28 }
  0xcf   :  { %v398_v11 = vsub.f32 %v396_v30, %v397_v31  ;;  %v405_v1 = vmul.f32 0.5, %v404_v12 }
  0xd1   :  { %623 = vrcp.f32 %v398_v11  ;;  %v406_v49 = vmul.f32 %v405_v1, %v405_v1  ;;  %vm508_vm2 = vcmp.gt.f32.partialorder %v398_v11, 0.0 }
  0xd2   :  { %vm509_vm3 = vmand %vm507_vm0, %vm508_vm2 }
  0xd3   :  { %v407_v32 = vsub.f32 %v406_v49, %v398_v11  ;;  %vm1039_vm4 = vmand %vm506_vm1, %vm509_vm3 }
  0xd4   :  { %v528_v38 = vsel %vm1039_vm4, %v622_v4, 0.0  ;;  %v534_v33 = vsel %vm1039_vm4, %v919_v22, 1e+30 }
  0xd5   :  { %v408_v45 = vmax.f32 %v407_v32, 0.1  ;;  %530 = vst [vmem:[#allocation15 + $0x48] sm:$0xff] %v528_v38  ;;  %536 = vst [vmem:[#allocation15 + $0x58] sm:$0xff] %v534_v33 }
  0xd7   :  { %625 = vrsqrt.f32 %v408_v45  ;;  %vm411_vm5 = vcmp.eq.f32.partialorder %v408_v45, inf  ;;  %v414_v40 = vand.u32 2147483648, %v408_v45  ;;  %vm413_vm6 = vcmp.eq.f32.partialorder %v408_v45, 0.0 }
  0xde   :  { %v624_v3 = vpop.eup %623 }
  0xdf   :  { %v400_v34 = vmul.f32 %v624_v3, %v395_v29  ;;  %v402_v5 = vmul.f32 %v624_v3, %v401_v21  ;;  %v403_v39 = vmul.f32 %v624_v3, %v384_v28 }
  0xe1   :  { %517 = vst [vmem:[#allocation15 + $0x18] sm:$0xff] %v400_v34  ;;  %519 = vst [vmem:[#allocation15 + $0x20] sm:$0xff] %v402_v5 }
  0xe2   :  { %521 = vst [vmem:[#allocation15 + $0x28] sm:$0xff] %v403_v39 }
  0xe4   :  { %v626_v9 = vpop.eup %625 }
  0xe5   :  { %v410_v44 = vmul.f32 %v626_v9, %v408_v45 }
  0xe7   :  { %v412_v16 = vsel %vm411_vm5, %v408_v45, %v410_v44 }
  0xe8   :  { %v415_v41 = vsel %vm413_vm6, %v414_v40, %v412_v16 }
  0xe9   :  { %v416_v22 = vadd.f32 %v415_v41, %v405_v1 }
  0xeb   :  { %627 = vrsqrt.f32 %v416_v22  ;;  %vm419_vm7 = vcmp.eq.f32.partialorder %v416_v22, inf  ;;  %v422_v19 = vand.u32 2147483648, %v416_v22  ;;  %vm421_vm8 = vcmp.eq.f32.partialorder %v416_v22, 0.0 }
  0xf8   :  { %v628_v18 = vpop.eup %627 }
  0xf9   :  { %v418_v42 = vmul.f32 %v628_v18, %v416_v22 }
  0xfb   :  { %v420_v43 = vsel %vm419_vm7, %v416_v22, %v418_v42 }
  0xfc   :  { %v423_v47 = vsel %vm421_vm8, %v422_v19, %v420_v43 }
  0xfd   :  { %v424_v23 = vmul.f32 3.0, %v423_v47 }
  0xff   :  { %v425_v48 = vceil.f32 %v424_v23 }
 0x101   :  { %v531_v24 = vsel %vm1039_vm4, %v425_v48, -1000000.0 }
 0x102   :  { %533 = vst [vmem:[#allocation15 + $0x50] sm:$0xff] %v531_v24 }
 0x103   :  { %768 = shalt.err (!%p765_p6)
}
 0x104   :  { %556 = dma.vmem_to_hbm [thread:$0]  %s551_s15, 2048, %s1063_s7, [#allocation4], %s791_s29, %s791_s29, %s792_s30  }
 0x105   :  { %787 = dma.done.wait [#allocation4], 2048  }
 0x106   :  { %788 = vsyncadd [#allocation4], 4294965248 }
 0x107   :  { %560 = vsyncpa [#allocation3], 1 }
 0x108   :  { %561 = vsyncpa [#allocation8], 1 }
 0x109   :  { %562 = vsyncpa [#allocation11], 1 }
 0x10a   :  { %563 = vsyncpa [#allocation14], 1 }
 0x10b   :  { %564 = vsyncpa [#allocation4], 1 }
 0x10c   :  { %565 = vsyncpa [#allocation5], 1 }

</bundles_post_ra>
